<compile_context>
chip_gen: v5e
topology: v5e:2x2
jax: 0.10.0
libtpu: 0.0.40
codegen_flags: <defaults>
</compile_context>

<pallas_src>
import jax
import jax.numpy as jnp
from jax import lax
from jax.experimental import pallas as pl
from jax.experimental.pallas import tpu as pltpu


# ---------------------------------------------------------------------------
# Pallas kernel
# ---------------------------------------------------------------------------
def _subblock_kernel(x_ref, w1_ref, b1_ref,
                     wc1_ref, bb1_ref,
                     wc2_ref, bb2_ref,
                     wc3_ref, bb3_ref,
                     o_ref):
    TR, W, Cin = x_ref.shape
    Cout = w1_ref.shape[1]
    RW = TR * W

    def mm(a_f32, w_ref):
        # bf16 MXU operands, f32 accumulation.
        return jnp.dot(a_f32.astype(jnp.bfloat16), w_ref[...],
                       preferred_element_type=jnp.float32)

    x2 = x_ref[...].reshape(RW, Cin)                     # (RW, Cin) f32

    # conv_1x1 (+ bias) -> identity
    y = mm(x2, w1_ref) + b1_ref[...]                     # (RW, Cout) f32
    identity = y

    # position-within-row index, hoisted (reused by all three convs)
    w_idx = lax.broadcasted_iota(jnp.int32, (RW, Cout), 0) % W

    def conv1x3(h, wc_ref, b_ref):
        # ReflectionPad2d((1,1,0,0)) + Conv2d kernel (1,3), fused into one
        # K = 3*Cout matmul. Rolls are along the flattened (TR*W) sublane
        # axis; the only cross-row contamination lands exactly on the rows
        # that the reflection fix overwrites (w == 0 / w == W-1).
        rp = pltpu.roll(h, shift=1, axis=0)              # h[i-1]  (left tap)
        rm = pltpu.roll(h, shift=RW - 1, axis=0)         # h[i+1]  (right tap)
        left = jnp.where(w_idx == 0, rm, rp)             # reflect: t[1] at w==0
        right = jnp.where(w_idx == W - 1, rp, rm)        # reflect: t[W-2] at w==W-1
        cat = jnp.concatenate([left, h, right], axis=-1)  # (RW, 3*Cout)
        return mm(cat, wc_ref) + b_ref[...]

    h = conv1x3(y, wc1_ref, bb1_ref)                     # conv_1 + bn_1 (folded)
    h = jnp.maximum(h, 0.0)                              # ReLU
    h = conv1x3(h, wc2_ref, bb2_ref)                     # conv_2
    h = conv1x3(h, wc3_ref, bb3_ref)                     # conv_3 + bn_2 (folded)

    o_ref[...] = (h + identity).reshape(TR, W, Cout)     # residual add


# ---------------------------------------------------------------------------
# Host-side parameter prep: fold BN affine + biases, fuse 3 taps, cast bf16
# ---------------------------------------------------------------------------
def _prep_params(p):
    C = p["w1"].shape[1]
    s1 = p["s1"].reshape(1, C)
    t1 = p["t1"].reshape(1, C)
    s2 = p["s2"].reshape(1, C)
    t2 = p["t2"].reshape(1, C)

    def fuse(wc):                       # (3, C, C) -> (3C, C), tap-major rows
        return wc.reshape(3 * C, C)

    return dict(
        w1=p["w1"].astype(jnp.bfloat16),
        b1=p["b1"].astype(jnp.float32),
        # conv_1 + bn_1: scale output channels by s1, merge bias with shift
        wc1=fuse(p["wc1"] * s1.reshape(1, 1, C)).astype(jnp.bfloat16),
        bb1=(p["bc1"] * s1 + t1).astype(jnp.float32),
        wc2=fuse(p["wc2"]).astype(jnp.bfloat16),
        bb2=p["bc2"].astype(jnp.float32),
        # conv_3 + bn_2: scale output channels by s2, merge bias with shift
        wc3=fuse(p["wc3"] * s2.reshape(1, 1, C)).astype(jnp.bfloat16),
        bb3=(p["bc3"] * s2 + t2).astype(jnp.float32),
    )


# ---------------------------------------------------------------------------
# Wrapper (layout conversion + tiled pallas_call)
# ---------------------------------------------------------------------------
def subblock_type_b(x_nchw, p, *, row_tile=256):
    N, Cin, H, W = x_nchw.shape
    Cout = p["w1"].shape[1]
    R = N * H
    TR = min(row_tile, R)

    # NCHW -> NHWC -> (N*H, W, C)
    x = jnp.transpose(x_nchw, (0, 2, 3, 1)).reshape(R, W, Cin)
    kp = _prep_params(p)

    const2 = lambda r: (0, 0)           # resident weights / biases

    out = pl.pallas_call(
        _subblock_kernel,
        out_shape=jax.ShapeDtypeStruct((R, W, Cout), jnp.float32),
        grid_spec=pltpu.PrefetchScalarGridSpec(
            num_scalar_prefetch=0,
            grid=(pl.cdiv(R, TR),),
            in_specs=[
                pl.BlockSpec((TR, W, Cin), lambda r: (r, 0, 0)),   # x tile
                pl.BlockSpec((Cin, Cout), const2),                 # w1
                pl.BlockSpec((1, Cout), const2),                   # b1
                pl.BlockSpec((3 * Cout, Cout), const2),            # wc1 (fused)
                pl.BlockSpec((1, Cout), const2),                   # bb1
                pl.BlockSpec((3 * Cout, Cout), const2),            # wc2 (fused)
                pl.BlockSpec((1, Cout), const2),                   # bb2
                pl.BlockSpec((3 * Cout, Cout), const2),            # wc3 (fused)
                pl.BlockSpec((1, Cout), const2),                   # bb3
            ],
            out_specs=pl.BlockSpec((TR, W, Cout), lambda r: (r, 0, 0)),
        ),
        compiler_params=pltpu.CompilerParams(
            dimension_semantics=("parallel",),
            vmem_limit_bytes=32 * 1024 * 1024,
        ),
    )(x, kp["w1"], kp["b1"],
      kp["wc1"], kp["bb1"],
      kp["wc2"], kp["bb2"],
      kp["wc3"], kp["bb3"])

    # (N*H, W, Cout) -> NCHW
    return jnp.transpose(out.reshape(N, H, W, Cout), (0, 3, 1, 2))


# ---------------------------------------------------------------------------
# Pure-JAX reference (lax.conv + jnp.pad reflect) for verification
# ---------------------------------------------------------------------------
def ref_forward(x_nchw, p):
    x = jnp.transpose(x_nchw, (0, 2, 3, 1))       # NHWC
    Cin = x.shape[-1]
    Cout = p["w1"].shape[1]

    def conv(t, w_hwio, b):
        dn = lax.conv_dimension_numbers(t.shape, w_hwio.shape,
                                        ("NHWC", "HWIO", "NHWC"))
        o = lax.conv_general_dilated(t, w_hwio, (1, 1), "VALID",
                                     dimension_numbers=dn,
                                     precision=lax.Precision.HIGHEST)
        return o + b.reshape(1, 1, 1, -1)

    def block(t, wc, bc):
        tp = jnp.pad(t, ((0, 0), (0, 0), (1, 1), (0, 0)), mode="reflect")
        return conv(tp, wc[None], bc)             # wc: (3, I, O) -> (1, 3, I, O)

    y = conv(x, p["w1"].reshape(1, 1, Cin, Cout), p["b1"])
    identity = y
    h = block(y, p["wc1"], p["bc1"])
    h = h * p["s1"].reshape(1, 1, 1, -1) + p["t1"].reshape(1, 1, 1, -1)
    h = jnp.maximum(h, 0.0)
    h = block(h, p["wc2"], p["bc2"])
    h = block(h, p["wc3"], p["bc3"])
    h = h * p["s2"].reshape(1, 1, 1, -1) + p["t2"].reshape(1, 1, 1, -1)
    return jnp.transpose(h + identity, (0, 3, 1, 2))


# ---------------------------------------------------------------------------
# Deterministic parameter construction (synthetic; krnl_size=(1,3), activ='relu')
# ---------------------------------------------------------------------------
def make_params(key, cin, cout):
    ks = jax.random.split(key, 24)
    eps = 1e-5

    def bn_fold(kg, kb, km, kv):
        gamma = 1.0 + 0.1 * jax.random.normal(kg, (1, cout), jnp.float32)
        beta = 0.1 * jax.random.normal(kb, (1, cout), jnp.float32)
        mean = 0.1 * jax.random.normal(km, (1, cout), jnp.float32)
        var = jax.random.uniform(kv, (1, cout), jnp.float32, 0.5, 1.5)
        scale = gamma / jnp.sqrt(var + eps)
        shift = beta - mean * scale
        return scale, shift

    s1, t1 = bn_fold(ks[10], ks[11], ks[12], ks[13])
    s2, t2 = bn_fold(ks[14], ks[15], ks[16], ks[17])

    return dict(
        w1=0.2 * jax.random.normal(ks[0], (cin, cout), jnp.float32),
        b1=0.1 * jax.random.normal(ks[1], (1, cout), jnp.float32),
        wc1=0.1 * jax.random.normal(ks[2], (3, cout, cout), jnp.float32),
        bc1=0.1 * jax.random.normal(ks[3], (1, cout), jnp.float32),
        wc2=0.1 * jax.random.normal(ks[4], (3, cout, cout), jnp.float32),
        bc2=0.1 * jax.random.normal(ks[5], (1, cout), jnp.float32),
        wc3=0.1 * jax.random.normal(ks[6], (3, cout, cout), jnp.float32),
        bc3=0.1 * jax.random.normal(ks[7], (1, cout), jnp.float32),
        s1=s1, t1=t1, s2=s2, t2=t2,
    )


if __name__ == "__main__":
    key = jax.random.PRNGKey(0)
    kx, kp = jax.random.split(key)

    N, Cin, H, W = 2, 4, 16, 16
    Cout = 32

    x = jax.random.normal(kx, (N, Cin, H, W), jnp.float32)
    params = make_params(kp, Cin, Cout)

    # row_tile=8 -> grid of 4 steps over R = N*H = 32 (exercises the pipeline)
    out = jax.block_until_ready(subblock_type_b(x, params, row_tile=8))
    ref = jax.block_until_ready(ref_forward(x, params))

    assert out.shape == (N, Cout, H, W), out.shape
    max_err = float(jnp.max(jnp.abs(out - ref)))
    # bf16 MXU operands vs f32 reference -> loosened tolerance
    assert max_err < 5e-2, f"max abs error too large: {max_err}"

    print("KERNEL_OK")
</pallas_src>

<mosaic_0001>
module attributes {stable_mosaic.version = 11 : i64} {
  func.func @_subblock_kernel(%arg0: i32, %arg1: memref<8x16x4xf32, #tpu.memory_space<vmem>>, %arg2: memref<4x32xbf16, #tpu.memory_space<vmem>>, %arg3: memref<1x32xf32, #tpu.memory_space<vmem>>, %arg4: memref<96x32xbf16, #tpu.memory_space<vmem>>, %arg5: memref<1x32xf32, #tpu.memory_space<vmem>>, %arg6: memref<96x32xbf16, #tpu.memory_space<vmem>>, %arg7: memref<1x32xf32, #tpu.memory_space<vmem>>, %arg8: memref<96x32xbf16, #tpu.memory_space<vmem>>, %arg9: memref<1x32xf32, #tpu.memory_space<vmem>>, %arg10: memref<8x16x32xf32, #tpu.memory_space<vmem>>) attributes {dimension_semantics = [#tpu.dimension_semantics<parallel>], iteration_bounds = array<i64: 4>, scalar_prefetch = 0 : i64, scratch_operands = 0 : i64, tpu.core_type = #tpu.core_type<tc>, window_params = [{transform_indices = @transform_0, window_bounds = array<i64: 8, 16, 4>}, {pipeline_mode = #tpu.pipeline_mode<synchronous>, transform_indices = @transform_1, window_bounds = array<i64: 4, 32>}, {pipeline_mode = #tpu.pipeline_mode<synchronous>, transform_indices = @transform_2, window_bounds = array<i64: 1, 32>}, {pipeline_mode = #tpu.pipeline_mode<synchronous>, transform_indices = @transform_3, window_bounds = array<i64: 96, 32>}, {pipeline_mode = #tpu.pipeline_mode<synchronous>, transform_indices = @transform_4, window_bounds = array<i64: 1, 32>}, {pipeline_mode = #tpu.pipeline_mode<synchronous>, transform_indices = @transform_5, window_bounds = array<i64: 96, 32>}, {pipeline_mode = #tpu.pipeline_mode<synchronous>, transform_indices = @transform_6, window_bounds = array<i64: 1, 32>}, {pipeline_mode = #tpu.pipeline_mode<synchronous>, transform_indices = @transform_7, window_bounds = array<i64: 96, 32>}, {pipeline_mode = #tpu.pipeline_mode<synchronous>, transform_indices = @transform_8, window_bounds = array<i64: 1, 32>}, {transform_indices = @transform_9, window_bounds = array<i64: 8, 16, 32>}]} {
    %c0 = arith.constant 0 : index
    %c0_0 = arith.constant 0 : index
    %c0_1 = arith.constant 0 : index
    %0 = vector.load %arg1[%c0, %c0_0, %c0_1] : memref<8x16x4xf32, #tpu.memory_space<vmem>>, vector<8x16x4xf32>
    %1 = vector.shape_cast %0 : vector<8x16x4xf32> to vector<128x4xf32>
    %2 = arith.truncf %1 : vector<128x4xf32> to vector<128x4xbf16>
    %c0_2 = arith.constant 0 : index
    %c0_3 = arith.constant 0 : index
    %3 = vector.load %arg2[%c0_2, %c0_3] : memref<4x32xbf16, #tpu.memory_space<vmem>>, vector<4x32xbf16>
    %cst = arith.constant dense<0.000000e+00> : vector<128x32xf32>
    %4 = tpu.matmul %2, %3, %cst {dimension_numbers = #tpu.dot_dimension_numbers<[1], [0], [0], [1], [0, 0, 1, 1], [], []>} : vector<128x4xbf16>, vector<4x32xbf16>, vector<128x32xf32> -> vector<128x32xf32>
    %c0_4 = arith.constant 0 : index
    %c0_5 = arith.constant 0 : index
    %5 = vector.load %arg3[%c0_4, %c0_5] : memref<1x32xf32, #tpu.memory_space<vmem>>, vector<1x32xf32>
    %6 = vector.broadcast %5 : vector<1x32xf32> to vector<128x32xf32>
    %7 = arith.addf %4, %6 : vector<128x32xf32>
    %8 = tpu.iota {dimensions = array<i32: 0>} : vector<128x32xi32>
    %c16_i32 = arith.constant 16 : i32
    %c0_i32 = arith.constant 0 : i32
    %9 = arith.cmpi eq, %c16_i32, %c0_i32 : i32
    %c1_i32 = arith.constant 1 : i32
    %10 = arith.select %9, %c1_i32, %c16_i32 : i32
    %11 = vector.broadcast %10 : i32 to vector<128x32xi32>
    %12 = arith.remsi %8, %11 : vector<128x32xi32>
    %c0_i32_6 = arith.constant 0 : i32
    %13 = vector.broadcast %c0_i32_6 : i32 to vector<128x32xi32>
    %14 = arith.cmpi ne, %12, %13 : vector<128x32xi32>
    %c0_i32_7 = arith.constant 0 : i32
    %15 = vector.broadcast %c0_i32_7 : i32 to vector<128x32xi32>
    %16 = arith.cmpi slt, %12, %15 : vector<128x32xi32>
    %c0_i32_8 = arith.constant 0 : i32
    %17 = arith.cmpi slt, %10, %c0_i32_8 : i32
    %18 = vector.broadcast %17 : i1 to vector<128x32xi1>
    %19 = vector.broadcast %18 : vector<128x32xi1> to vector<128x32xi1>
    %20 = arith.xori %16, %19 : vector<128x32xi1>
    %21 = arith.andi %20, %14 : vector<128x32xi1>
    %22 = vector.broadcast %10 : i32 to vector<128x32xi32>
    %23 = arith.addi %12, %22 : vector<128x32xi32>
    %24 = arith.select %21, %23, %12 : vector<128x32xi1>, vector<128x32xi32>
    %c1_i32_9 = arith.constant 1 : i32
    %25 = tpu.dynamic_rotate %7 by %c1_i32_9 dim 0 : vector<128x32xf32>, i32 -> vector<128x32xf32>
    %c127_i32 = arith.constant 127 : i32
    %26 = tpu.dynamic_rotate %7 by %c127_i32 dim 0 : vector<128x32xf32>, i32 -> vector<128x32xf32>
    %c0_i32_10 = arith.constant 0 : i32
    %27 = vector.broadcast %c0_i32_10 : i32 to vector<128x32xi32>
    %28 = arith.cmpi eq, %24, %27 : vector<128x32xi32>
    %29 = arith.select %28, %26, %25 : vector<128x32xi1>, vector<128x32xf32>
    %c15_i32 = arith.constant 15 : i32
    %30 = vector.broadcast %c15_i32 : i32 to vector<128x32xi32>
    %31 = arith.cmpi eq, %24, %30 : vector<128x32xi32>
    %32 = arith.select %31, %25, %26 : vector<128x32xi1>, vector<128x32xf32>
    %33 = tpu.concatenate %29, %7, %32 in 1 : vector<128x32xf32>, vector<128x32xf32>, vector<128x32xf32> -> vector<128x96xf32>
    %34 = arith.truncf %33 : vector<128x96xf32> to vector<128x96xbf16>
    %c0_11 = arith.constant 0 : index
    %c0_12 = arith.constant 0 : index
    %35 = vector.load %arg4[%c0_11, %c0_12] : memref<96x32xbf16, #tpu.memory_space<vmem>>, vector<96x32xbf16>
    %cst_13 = arith.constant dense<0.000000e+00> : vector<128x32xf32>
    %36 = tpu.matmul %34, %35, %cst_13 {dimension_numbers = #tpu.dot_dimension_numbers<[1], [0], [0], [1], [0, 0, 1, 1], [], []>} : vector<128x96xbf16>, vector<96x32xbf16>, vector<128x32xf32> -> vector<128x32xf32>
    %c0_14 = arith.constant 0 : index
    %c0_15 = arith.constant 0 : index
    %37 = vector.load %arg5[%c0_14, %c0_15] : memref<1x32xf32, #tpu.memory_space<vmem>>, vector<1x32xf32>
    %38 = vector.broadcast %37 : vector<1x32xf32> to vector<128x32xf32>
    %39 = arith.addf %36, %38 : vector<128x32xf32>
    %cst_16 = arith.constant 0.000000e+00 : f32
    %40 = vector.broadcast %cst_16 : f32 to vector<128x32xf32>
    %41 = arith.maximumf %39, %40 : vector<128x32xf32>
    %c1_i32_17 = arith.constant 1 : i32
    %42 = tpu.dynamic_rotate %41 by %c1_i32_17 dim 0 : vector<128x32xf32>, i32 -> vector<128x32xf32>
    %c127_i32_18 = arith.constant 127 : i32
    %43 = tpu.dynamic_rotate %41 by %c127_i32_18 dim 0 : vector<128x32xf32>, i32 -> vector<128x32xf32>
    %c0_i32_19 = arith.constant 0 : i32
    %44 = vector.broadcast %c0_i32_19 : i32 to vector<128x32xi32>
    %45 = arith.cmpi eq, %24, %44 : vector<128x32xi32>
    %46 = arith.select %45, %43, %42 : vector<128x32xi1>, vector<128x32xf32>
    %c15_i32_20 = arith.constant 15 : i32
    %47 = vector.broadcast %c15_i32_20 : i32 to vector<128x32xi32>
    %48 = arith.cmpi eq, %24, %47 : vector<128x32xi32>
    %49 = arith.select %48, %42, %43 : vector<128x32xi1>, vector<128x32xf32>
    %50 = tpu.concatenate %46, %41, %49 in 1 : vector<128x32xf32>, vector<128x32xf32>, vector<128x32xf32> -> vector<128x96xf32>
    %51 = arith.truncf %50 : vector<128x96xf32> to vector<128x96xbf16>
    %c0_21 = arith.constant 0 : index
    %c0_22 = arith.constant 0 : index
    %52 = vector.load %arg6[%c0_21, %c0_22] : memref<96x32xbf16, #tpu.memory_space<vmem>>, vector<96x32xbf16>
    %cst_23 = arith.constant dense<0.000000e+00> : vector<128x32xf32>
    %53 = tpu.matmul %51, %52, %cst_23 {dimension_numbers = #tpu.dot_dimension_numbers<[1], [0], [0], [1], [0, 0, 1, 1], [], []>} : vector<128x96xbf16>, vector<96x32xbf16>, vector<128x32xf32> -> vector<128x32xf32>
    %c0_24 = arith.constant 0 : index
    %c0_25 = arith.constant 0 : index
    %54 = vector.load %arg7[%c0_24, %c0_25] : memref<1x32xf32, #tpu.memory_space<vmem>>, vector<1x32xf32>
    %55 = vector.broadcast %54 : vector<1x32xf32> to vector<128x32xf32>
    %56 = arith.addf %53, %55 : vector<128x32xf32>
    %c1_i32_26 = arith.constant 1 : i32
    %57 = tpu.dynamic_rotate %56 by %c1_i32_26 dim 0 : vector<128x32xf32>, i32 -> vector<128x32xf32>
    %c127_i32_27 = arith.constant 127 : i32
    %58 = tpu.dynamic_rotate %56 by %c127_i32_27 dim 0 : vector<128x32xf32>, i32 -> vector<128x32xf32>
    %c0_i32_28 = arith.constant 0 : i32
    %59 = vector.broadcast %c0_i32_28 : i32 to vector<128x32xi32>
    %60 = arith.cmpi eq, %24, %59 : vector<128x32xi32>
    %61 = arith.select %60, %58, %57 : vector<128x32xi1>, vector<128x32xf32>
    %c15_i32_29 = arith.constant 15 : i32
    %62 = vector.broadcast %c15_i32_29 : i32 to vector<128x32xi32>
    %63 = arith.cmpi eq, %24, %62 : vector<128x32xi32>
    %64 = arith.select %63, %57, %58 : vector<128x32xi1>, vector<128x32xf32>
    %65 = tpu.concatenate %61, %56, %64 in 1 : vector<128x32xf32>, vector<128x32xf32>, vector<128x32xf32> -> vector<128x96xf32>
    %66 = arith.truncf %65 : vector<128x96xf32> to vector<128x96xbf16>
    %c0_30 = arith.constant 0 : index
    %c0_31 = arith.constant 0 : index
    %67 = vector.load %arg8[%c0_30, %c0_31] : memref<96x32xbf16, #tpu.memory_space<vmem>>, vector<96x32xbf16>
    %cst_32 = arith.constant dense<0.000000e+00> : vector<128x32xf32>
    %68 = tpu.matmul %66, %67, %cst_32 {dimension_numbers = #tpu.dot_dimension_numbers<[1], [0], [0], [1], [0, 0, 1, 1], [], []>} : vector<128x96xbf16>, vector<96x32xbf16>, vector<128x32xf32> -> vector<128x32xf32>
    %c0_33 = arith.constant 0 : index
    %c0_34 = arith.constant 0 : index
    %69 = vector.load %arg9[%c0_33, %c0_34] : memref<1x32xf32, #tpu.memory_space<vmem>>, vector<1x32xf32>
    %70 = vector.broadcast %69 : vector<1x32xf32> to vector<128x32xf32>
    %71 = arith.addf %68, %70 : vector<128x32xf32>
    %72 = arith.addf %71, %7 : vector<128x32xf32>
    %73 = vector.shape_cast %72 : vector<128x32xf32> to vector<8x16x32xf32>
    %c0_35 = arith.constant 0 : index
    %c0_36 = arith.constant 0 : index
    %c0_37 = arith.constant 0 : index
    %74 = vector.load %arg10[%c0_35, %c0_36, %c0_37] : memref<8x16x32xf32, #tpu.memory_space<vmem>>, vector<8x16x32xf32>
    tpu.vector_store %arg10[%c0_35, %c0_36, %c0_37], %73 {strides = array<i32>} : memref<8x16x32xf32, #tpu.memory_space<vmem>>, vector<8x16x32xf32>,
    return
  }
  func.func @transform_0(%arg0: i32) -> (i32, i32, i32) {
    %c0_i32 = arith.constant 0 : i32
    %c0_i32_0 = arith.constant 0 : i32
    %c0_i32_1 = arith.constant 0 : i32
    return %arg0, %c0_i32, %c0_i32_0 : i32, i32, i32
  }
  func.func @transform_1(%arg0: i32) -> (i32, i32) {
    %c0_i32 = arith.constant 0 : i32
    %c0_i32_0 = arith.constant 0 : i32
    %c0_i32_1 = arith.constant 0 : i32
    return %c0_i32, %c0_i32_0 : i32, i32
  }
  func.func @transform_2(%arg0: i32) -> (i32, i32) {
    %c0_i32 = arith.constant 0 : i32
    %c0_i32_0 = arith.constant 0 : i32
    %c0_i32_1 = arith.constant 0 : i32
    return %c0_i32, %c0_i32_0 : i32, i32
  }
  func.func @transform_3(%arg0: i32) -> (i32, i32) {
    %c0_i32 = arith.constant 0 : i32
    %c0_i32_0 = arith.constant 0 : i32
    %c0_i32_1 = arith.constant 0 : i32
    return %c0_i32, %c0_i32_0 : i32, i32
  }
  func.func @transform_4(%arg0: i32) -> (i32, i32) {
    %c0_i32 = arith.constant 0 : i32
    %c0_i32_0 = arith.constant 0 : i32
    %c0_i32_1 = arith.constant 0 : i32
    return %c0_i32, %c0_i32_0 : i32, i32
  }
  func.func @transform_5(%arg0: i32) -> (i32, i32) {
    %c0_i32 = arith.constant 0 : i32
    %c0_i32_0 = arith.constant 0 : i32
    %c0_i32_1 = arith.constant 0 : i32
    return %c0_i32, %c0_i32_0 : i32, i32
  }
  func.func @transform_6(%arg0: i32) -> (i32, i32) {
    %c0_i32 = arith.constant 0 : i32
    %c0_i32_0 = arith.constant 0 : i32
    %c0_i32_1 = arith.constant 0 : i32
    return %c0_i32, %c0_i32_0 : i32, i32
  }
  func.func @transform_7(%arg0: i32) -> (i32, i32) {
    %c0_i32 = arith.constant 0 : i32
    %c0_i32_0 = arith.constant 0 : i32
    %c0_i32_1 = arith.constant 0 : i32
    return %c0_i32, %c0_i32_0 : i32, i32
  }
  func.func @transform_8(%arg0: i32) -> (i32, i32) {
    %c0_i32 = arith.constant 0 : i32
    %c0_i32_0 = arith.constant 0 : i32
    %c0_i32_1 = arith.constant 0 : i32
    return %c0_i32, %c0_i32_0 : i32, i32
  }
  func.func @transform_9(%arg0: i32) -> (i32, i32, i32) {
    %c0_i32 = arith.constant 0 : i32
    %c0_i32_0 = arith.constant 0 : i32
    %c0_i32_1 = arith.constant 0 : i32
    return %arg0, %c0_i32, %c0_i32_0 : i32, i32, i32
  }
}

</mosaic_0001>

<bundles_post_ra>
// kernel: tpu_custom_call.1
= control target key start
LH: loop header
LB: loop body
LE: loop exit
PB: predicated region body
PF: predicated region fallthrough
CT: control target
= control target key end

     0   :  { %14 = vsyncpa [#allocation3], 0  ;;  %s3849_s0 = inlined_call_operand.vmem [shape: f32[32,16,4], index: 0, kind: input, shape index: {}]   ;;  %s3850_s1 = inlined_call_operand.vmem [shape: bf16[4,32], index: 1, kind: input, shape index: {}]   ;;  %s3851_s2 = inlined_call_operand.vmem [shape: f32[1,32], index: 2, kind: input, shape index: {}]   ;;  %s3852_s3 = inlined_call_operand.vmem [shape: bf16[96,32], index: 3, kind: input, shape index: {}]   ;;  %s3853_s4 = inlined_call_operand.vmem [shape: f32[1,32], index: 4, kind: input, shape index: {}]   ;;  %s3854_s5 = inlined_call_operand.vmem [shape: bf16[96,32], index: 5, kind: input, shape index: {}]   ;;  %s3855_s6 = inlined_call_operand.vmem [shape: f32[1,32], index: 6, kind: input, shape index: {}]   ;;  %s3856_s7 = inlined_call_operand.vmem [shape: bf16[96,32], index: 7, kind: input, shape index: {}]   ;;  %s3857_s8 = inlined_call_operand.vmem [shape: f32[1,32], index: 8, kind: input, shape index: {}]   ;;  %s3858_s9 = inlined_call_operand.hbm [shape: f32[32,16,32], index: 9, kind: output, shape index: {}]  }
   0x1   :  { %16 = vsyncpa [#allocation3 + $0x1], 0  ;;  %s2529_s30 = smov 0   ;;  %s2531_s10 = smov 0  }
   0x2   :  { %s2533_s11 = smov 0   ;;  %s2535_s12 = smov 0  }
   0x3 LB: > { %s2550_s13 = sadd.s32 4294967295, %s2473_s12   ;;  %s1985_s14 = sadd.s32 4294967294, %s2473_s12   ;;  %s2473_s12 = sphi %s2535_s12, %s4093_s12   ;;  %s2469_s11 = sphi %s2533_s11, %s4092_s11   ;;  %s2465_s10 = sphi %s2531_s10, %s4091_s10   ;;  %s2461_s30 = sphi %s2529_s30, %s4090_s30  }
   0x4   : > { %s2554_s15 = sadd.s32 1, %s2473_s12   ;;  %s223_s16 = sadd.s32 1, %s2469_s11 }
   0x5   : > { %s220_s17 = ssub.s32 %s2473_s12, %s2554_s15  ;;  %p233_p0 = scmp.ne.s32.totalorder %s2469_s11, %s2465_s10 }
   0x6   : > { %p221_p1 = scmp.eq.s32.totalorder %s220_s17, 0  ;;  %p234_p2 = scmp.eq.s32.totalorder %s2550_s13, 3 }
   0x7   : > { %p239_p3 = scmp.ne.s32.totalorder %s2465_s10, %s2461_s30  ;;  %p240_p4 = scmp.eq.s32.totalorder %s1985_s14, 3 }
   0x8   : > { %s2565_s18 = scalar_select %p221_p1, %s2469_s11, %s223_s16  }
   0x9   : > { %p2567_p5 = por %p234_p2, %p233_p0  ;;  %p2571_p6 = por %p240_p4, %p239_p3 }
   0xa   : > { %p1988_p7 = scmp.ge.s32.totalorder %s2473_s12, 1  ;;  %p292_p8 = scmp.lt.s32.totalorder %s2473_s12, 5 }
   0xc   : > { %p293_p9 = pnand %p1988_p7, %p292_p8 }
   0xe   : > { %296 = sbr.rel (%p293_p9) target bundleno = 1106 (0x452), region = 56 }
  0x13   : > { %v362_v0 = vld [vmem:[%s3850_s1] sm:$0x3]  ;;  %vm392_vm0 = vcmask 1041408   ;;  %s1990_s23 = sshll.u32 %s2550_s13, 3  ;;  %vm367_vm1 = vcmask 31744   ;;  %v445_v27 = vlaneseq  ;;  %s2475_s14 = smov 32  }
  0x14   : > { %v394_v1 = vsel %vm392_vm0, %v362_v0, 0  ;;  %p330_p10 = scmp.lt.s32.totalorder %s1990_s23, 31  ;;  %v2613_v28 = vld [vmem:[%s3851_s2] ss:$0 sm:$0xff]  ;;  %s2476_s16 = smov 64  }
  0x15   : > { %403 = vmatpush.bf16.msra.mxu0 %v394_v1  ;;  %v2615_v30 = vshrl.u32 %v445_v27, 7 }
  0x16   : > { %s4095_s23 = smov (!%p330_p10, %s1990_s23), 31 }
  0x17   : > { %s2103_s24 = sshll.u32 %s4095_s23, 4  ;;  %v447_v33 = vadd.s32 8, %v2615_v30  ;;  %vm3881_vm2 = vcmp.lt.s32.totalorder %v2615_v30, 1  ;;  %vm3862_vm3 = vcmp.lt.s32.totalorder %v2615_v30, 7  ;;  %v448_v44 = vadd.s32 16, %v2615_v30  ;;  %s2123_s23 = sshll.u32 %s2550_s13, 7 }
  0x18   : > { %s2584_s27 = scalar_lea.vmem %s3849_s0, %s2103_s24  ;;  %v449_v57 = vadd.s32 24, %v2615_v30  ;;  %s1919_s26 = scalar_lea.hbm %s3858_s9, %s2123_s23 }
  0x19   : > { %v338_v2 = vld [vmem:[%s2584_s27] sm:$0xff]  ;;  %v339_v3 = vld [vmem:[%s2584_s27 + $0x8] sm:$0xff]  ;;  %v340_v5 = vld [vmem:[%s2584_s27 + $0x10] sm:$0xff]  ;;  %v473_v35 = vand.u32 15, %v447_v33  ;;  %v480_v52 = vand.u32 15, %v448_v44  ;;  %v453_v44 = vadd.s32 56, %v2615_v30 }
  0x1a   : > { %v354_v4 = vpack.c.bf16 %v339_v3, %v338_v2  ;;  %v341_v6 = vld [vmem:[%s2584_s27 + $0x18] sm:$0xff]  ;;  %v342_v8 = vld [vmem:[%s2584_s27 + $0x20] sm:$0xff]  ;;  %v343_v9 = vld [vmem:[%s2584_s27 + $0x28] sm:$0xff]  ;;  %v487_v61 = vand.u32 15, %v449_v57  ;;  %s1922_s28 = sshll.u32 %s1919_s26, 4  ;;  %s2431_s23 = scalar_lea.hbm %s3858_s9, 512  ;;  %s1923_s28 = int_to_ptr.hbm [resolvable:$true] %s1922_s28 }
  0x1b   : > { %v355_v7 = vpack.c.bf16 %v341_v6, %v340_v5  ;;  %v356_v10 = vpack.c.bf16 %v343_v9, %v342_v8  ;;  %v344_v11 = vld [vmem:[%s2584_s27 + $0x30] sm:$0xff]  ;;  %v345_v12 = vld [vmem:[%s2584_s27 + $0x38] sm:$0xff]  ;;  %v346_v14 = vld [vmem:[%s2584_s27 + $0x40] sm:$0xff]  ;;  %vm2634_vm4 = vcmp.eq.s32.totalorder %v473_v35, 15  ;;  %vm2673_vm5 = vcmp.eq.s32.totalorder %v480_v52, 0  ;;  %s2425_s29 = sshra.s32 %s1923_s28, 4  ;;  %s2426_s29 = int_to_ptr.hbm [resolvable:$true] %s2425_s29 }
  0x1c   : > { %1993 = vmatmul.msk.bf16.vlgmr.msra.gmra.mxu0 %vm367_vm1, %v354_v4  ;;  %v357_v13 = vpack.c.bf16 %v345_v12, %v344_v11  ;;  %v347_v15 = vld [vmem:[%s2584_s27 + $0x48] sm:$0xff]  ;;  %v348_v17 = vld [vmem:[%s2584_s27 + $0x50] sm:$0xff]  ;;  %v349_v18 = vld [vmem:[%s2584_s27 + $0x58] sm:$0xff]  ;;  %vm2692_vm6 = vcmp.eq.s32.totalorder %v487_v61, 15  ;;  %v450_v4 = vadd.s32 32, %v2615_v30  ;;  %v515_v52 = vand.u32 15, %v453_v44  ;;  %p2432_p0 = scmp.lt.s32.totalorder %s2426_s29, %s3858_s9 }
  0x1d   : > { %v358_v16 = vpack.c.bf16 %v347_v15, %v346_v14  ;;  %v359_v19 = vpack.c.bf16 %v349_v18, %v348_v17  ;;  %v350_v20 = vld [vmem:[%s2584_s27 + $0x60] sm:$0xff]  ;;  %v351_v21 = vld [vmem:[%s2584_s27 + $0x68] sm:$0xff]  ;;  %v352_v23 = vld [vmem:[%s2584_s27 + $0x70] sm:$0xff]  ;;  %v451_v15 = vadd.s32 40, %v2615_v30 }
  0x1e   : > { %v360_v22 = vpack.c.bf16 %v351_v21, %v350_v20  ;;  %v353_v24 = vld [vmem:[%s2584_s27 + $0x78] sm:$0xff]  ;;  %vm2784_vm10 = vcmp.eq.s32.totalorder %v515_v52, 15 }
  0x1f   : > { %v361_v25 = vpack.c.bf16 %v353_v24, %v352_v23 }
  0x2c   : > { %1994 = vmatmul.msk.bf16.gmra.mxu0 %vm367_vm1, %v355_v7 }
  0x3c   : > { %1995 = vmatmul.msk.bf16.gmra.mxu0 %vm367_vm1, %v356_v10  ;;  %v494_v10 = vand.u32 15, %v450_v4 }
  0x3e   : > { %vm2719_vm7 = vcmp.eq.s32.totalorder %v494_v10, 0 }
  0x4c   : > { %1996 = vmatmul.msk.bf16.gmra.mxu0 %vm367_vm1, %v357_v13 }
  0x5c   : > { %1997 = vmatmul.msk.bf16.gmra.mxu0 %vm367_vm1, %v358_v16 }
  0x6c   : > { %1998 = vmatmul.msk.bf16.gmra.mxu0 %vm367_vm1, %v359_v19  ;;  %v501_v19 = vand.u32 15, %v451_v15  ;;  %v455_v15 = vadd.s32 72, %v2615_v30 }
  0x6e   : > { %vm2738_vm8 = vcmp.eq.s32.totalorder %v501_v19, 15 }
  0x7c   : > { %1999 = vmatmul.msk.bf16.gmra.mxu0 %vm367_vm1, %v360_v22 }
  0x8c   : > { %2000 = vmatmul.msk.bf16.gmra.mxu0 %vm367_vm1, %v361_v25 }
  0x99   : > { %v405_v26 = vpop.f32.mrf.mxu0 }
  0x9a   : > { %v2618_v31 = vadd.f32 %v2613_v28, %v405_v26  ;;  %v452_v26 = vadd.s32 48, %v2615_v30 }
  0x9c   : > { %v3859_v41 = vrot.slane %v2618_v31, 7  ;;  %v3860_v45 = vrot.slane %v2618_v31, 1 }
  0xa1   : > { %v407_v29 = vpop.f32.mrf.mxu0 }
  0xa2   : > { %v2621_v32 = vadd.f32 %v2613_v28, %v407_v29 }
  0xa4   : > { %v2167_v34 = vpack.i.bf16 %v2621_v32, %v2618_v31  ;;  %v655_v37 = vrot.slane %v2621_v32, 7  ;;  %v688_v39 = vrot.slane %v2621_v32, 1 }
  0xa6   : > { %2168 = vrot.lane.b32.xlu0 %v2167_v34, %s2475_s14  ;;  %v2647_v46 = vsel %vm3881_vm2, %v3859_v41, %v655_v37  ;;  %v2659_v49 = vsel %vm3862_vm3, %v3860_v45, %v688_v39 }
  0xa9   : > { %v410_v36 = vpop.f32.mrf.mxu0 }
  0xaa   : > { %v2629_v38 = vadd.f32 %v2613_v28, %v410_v36  ;;  %v508_v36 = vand.u32 15, %v452_v26 }
  0xac   : > { %v656_v42 = vrot.slane %v2629_v38, 7  ;;  %v689_v43 = vrot.slane %v2629_v38, 1  ;;  %vm2765_vm9 = vcmp.eq.s32.totalorder %v508_v36, 0  ;;  %v3907_v36 = vmov 0 }
  0xae   : > { %v717_v47 = vsel %vm3862_vm3, %v688_v39, %v689_v43  ;;  %v2653_v48 = vsel %vm3881_vm2, %v655_v37, %v656_v42 }
  0xaf   : > { %v769_v50 = vsel %vm2634_vm4, %v2647_v46, %v717_v47 }
  0xb0   : > { %v2172_v51 = vpack.i.bf16 %v769_v50, %v2659_v49 }
  0xb1   : > { %v412_v53 = vpop.f32.mrf.mxu0 }
  0xb2   : > { %v2666_v54 = vadd.f32 %v2613_v28, %v412_v53  ;;  %2173 = vrot.lane.b32.xlu0 %v2172_v51, %s2476_s16  ;;  %v3919_v51 = vmov 0 }
  0xb4   : > { %v690_v55 = vrot.slane %v2666_v54, 1  ;;  %v2177_v56 = vpack.i.bf16 %v2666_v54, %v2629_v38  ;;  %v657_v63 = vrot.slane %v2666_v54, 7 }
  0xb6   : > { %2178 = vrot.lane.b32.xlu1 %v2177_v56, %s2475_s14  ;;  %v2680_v59 = vsel %vm3862_vm3, %v689_v43, %v690_v55  ;;  %v2699_v5 = vsel %vm3881_vm2, %v656_v42, %v657_v63 }
  0xb9   : > { %v415_v62 = vpop.f32.mrf.mxu0 }
  0xba   : > { %v2688_v0 = vadd.f32 %v2613_v28, %v415_v62  ;;  %v3901_v62 = vmov 0 }
  0xbb   : > { %v3902_v62 = vsel %vm2784_vm10, 4294967295, %v3901_v62 }
  0xbc   : > { %v658_v1 = vrot.slane %v2688_v0, 7  ;;  %v691_v2 = vrot.slane %v2688_v0, 1 }
  0xbe   : > { %v715_v6 = vsel %vm3862_vm3, %v690_v55, %v691_v2  ;;  %v2705_v7 = vsel %vm3881_vm2, %v657_v63, %v658_v1  ;;  %v454_v63 = vadd.s32 64, %v2615_v30 }
  0xbf   : > { %v771_v8 = vsel %vm2692_vm6, %v2699_v5, %v715_v6 }
  0xc0   : > { %v2182_v9 = vpack.i.bf16 %v771_v8, %v2680_v59 }
  0xc1   : > { %v417_v11 = vpop.f32.mrf.mxu0 }
  0xc2   : > { %v2712_v12 = vadd.f32 %v2613_v28, %v417_v11  ;;  %2183 = vrot.lane.b32.xlu1 %v2182_v9, %s2476_s16  ;;  %v522_v9 = vand.u32 15, %v454_v63 }
  0xc4   : > { %v692_v13 = vrot.slane %v2712_v12, 1  ;;  %v2187_v14 = vpack.i.bf16 %v2712_v12, %v2688_v0  ;;  %v659_v21 = vrot.slane %v2712_v12, 7  ;;  %vm2811_vm11 = vcmp.eq.s32.totalorder %v522_v9, 0 }
  0xc6   : > { %2188 = vrot.lane.b32.xlu2 %v2187_v14, %s2475_s14  ;;  %v2726_v17 = vsel %vm3862_vm3, %v691_v2, %v692_v13  ;;  %v2745_v27 = vsel %vm3881_vm2, %v658_v1, %v659_v21 }
  0xc9   : > { %v420_v20 = vpop.f32.mrf.mxu0 }
  0xca   : > { %v2734_v22 = vadd.f32 %v2613_v28, %v420_v20 }
  0xcc   : > { %v660_v23 = vrot.slane %v2734_v22, 7  ;;  %v693_v24 = vrot.slane %v2734_v22, 1 }
  0xce   : > { %v713_v29 = vsel %vm3862_vm3, %v692_v13, %v693_v24  ;;  %v2751_v33 = vsel %vm3881_vm2, %v659_v21, %v660_v23  ;;  %v460_v21 = vadd.s32 112, %v2615_v30 }
  0xcf   : > { %v773_v34 = vsel %vm2738_vm8, %v2745_v27, %v713_v29 }
  0xd0   : > { %v2192_v35 = vpack.i.bf16 %v773_v34, %v2726_v17  ;;  %v564_v18 = vand.u32 15, %v460_v21 }
  0xd1   : > { %v422_v37 = vpop.f32.mrf.mxu0 }
  0xd2   : > { %v2758_v39 = vadd.f32 %v2613_v28, %v422_v37  ;;  %2193 = vrot.lane.b32.xlu2 %v2192_v35, %s2476_s16  ;;  %v456_v37 = vadd.s32 80, %v2615_v30  ;;  %vm2964_vm1 = vcmp.eq.s32.totalorder %v564_v18, 0 }
  0xd4   : > { %3897 = vst [vmem:[#allocation5_spill] sm:$0xff] %v2758_v39  ;;  %v694_v42 = vrot.slane %v2758_v39, 1  ;;  %v2197_v43 = vpack.i.bf16 %v2758_v39, %v2734_v22  ;;  %v661_v55 = vrot.slane %v2758_v39, 7 }
  0xd6   : > { %2198 = vrot.lane.b32.xlu0 %v2197_v43, %s2475_s14  ;;  %v2772_v50 = vsel %vm3862_vm3, %v693_v24, %v694_v42  ;;  %v2791_v1 = vsel %vm3881_vm2, %v660_v23, %v661_v55  ;;  %v529_v23 = vand.u32 15, %v455_v15 }
  0xd8   : > { %vm2830_vm12 = vcmp.eq.s32.totalorder %v529_v23, 15 }
  0xd9   : > { %v425_v53 = vpop.f32.mrf.mxu0  ;;  %v3908_v36 = vsel %vm2830_vm12, 4294967295, %v3907_v36 }
  0xda   : > { %v2780_v56 = vadd.f32 %v2613_v28, %v425_v53 }
  0xdc   : > { %3900 = vst [vmem:[#allocation6_spill] sm:$0xff] %v2780_v56  ;;  %v662_v57 = vrot.slane %v2780_v56, 7  ;;  %v695_v61 = vrot.slane %v2780_v56, 1 }
  0xde   : > { %v711_v2 = vsel %vm3862_vm3, %v694_v42, %v695_v61  ;;  %v2797_v4 = vsel %vm3881_vm2, %v661_v55, %v662_v57  ;;  %v536_v55 = vand.u32 15, %v456_v37 }
  0xdf   : > { %v775_v6 = vsel %vm2784_vm10, %v2791_v1, %v711_v2 }
  0xe0   : > { %v2202_v8 = vpack.i.bf16 %v775_v6, %v2772_v50  ;;  %vm2860_vm13 = vcmp.eq.s32.totalorder %v536_v55, 0  ;;  %v458_v55 = vadd.s32 96, %v2615_v30 }
  0xe1   : > { %v427_v10 = vpop.f32.mrf.mxu0 }
  0xe2   : > { %v2804_v11 = vadd.f32 %v2613_v28, %v427_v10  ;;  %2203 = vrot.lane.b32.xlu1 %v2202_v8, %s2476_s16  ;;  %v457_v8 = vadd.s32 88, %v2615_v30  ;;  %v2108_v10 = vld [vmem:[%s3852_s3 + $0x20] sm:$0xff] }
  0xe4   : > { %3903 = vst [vmem:[#allocation7_spill] sm:$0xff] %v2804_v11  ;;  %v696_v13 = vrot.slane %v2804_v11, 1  ;;  %v2207_v14 = vpack.i.bf16 %v2804_v11, %v2780_v56  ;;  %v663_v26 = vrot.slane %v2804_v11, 7  ;;  %v543_v15 = vand.u32 15, %v457_v8 }
  0xe6   : > { %2208 = vrot.lane.b32.xlu2 %v2207_v14, %s2475_s14  ;;  %v2818_v20 = vsel %vm3862_vm3, %v695_v61, %v696_v13  ;;  %v2837_v42 = vsel %vm3881_vm2, %v662_v57, %v663_v26  ;;  %v2109_v57 = vld [vmem:[%s3852_s3 + $0x28] sm:$0xff]  ;;  %vm2888_vm14 = vcmp.eq.s32.totalorder %v543_v15, 15  ;;  %v550_v15 = vand.u32 15, %v458_v55 }
  0xe7   : > { %1033 = vmatpush.bf16.msra.mxu1 %v2109_v57 }
  0xe8   : > { %vm2918_vm15 = vcmp.eq.s32.totalorder %v550_v15, 0 }
  0xe9   : > { %v430_v24 = vpop.f32.mrf.mxu0 }
  0xea   : > { %v2826_v29 = vadd.f32 %v2613_v28, %v430_v24  ;;  %v2107_v24 = vld [vmem:[%s3852_s3 + $0x18] sm:$0xff] }
  0xeb   : > { %1034 = vmatpush.bf16.msra.mxu1 %v2108_v10 }
  0xec   : > { %3906 = vst [vmem:[#allocation8_spill] sm:$0xff] %v2826_v29  ;;  %v664_v34 = vrot.slane %v2826_v29, 7  ;;  %v697_v35 = vrot.slane %v2826_v29, 1 }
  0xee   : > { %v709_v43 = vsel %vm3862_vm3, %v696_v13, %v697_v35  ;;  %v2843_v44 = vsel %vm3881_vm2, %v663_v26, %v664_v34 }
  0xef   : > { %v777_v52 = vsel %vm2830_vm12, %v2837_v42, %v709_v43  ;;  %1035 = vmatpush.bf16.msra.mxu1 %v2107_v24  ;;  %vm3878_vm12 = vcmask 785408  }
  0xf0   : > { %v2212_v53 = vpack.i.bf16 %v777_v52, %v2818_v20 }
  0xf1   : > { %v432_v61 = vpop.f32.mrf.mxu0 }
  0xf2   : > { %v2853_v63 = vadd.f32 %v2613_v28, %v432_v61  ;;  %2213 = vrot.lane.b32.xlu0 %v2212_v53, %s2476_s16  ;;  %v3913_v53 = vmov 0 }
  0xf3   : > { %v3914_v53 = vsel %vm2888_vm14, 4294967295, %v3913_v53 }
  0xf4   : > { %3909 = vst [vmem:[#allocation9_spill] sm:$0xff] %v2853_v63  ;;  %v698_v2 = vrot.slane %v2853_v63, 1  ;;  %v2217_v6 = vpack.i.bf16 %v2853_v63, %v2826_v29  ;;  %v665_v26 = vrot.slane %v2853_v63, 7 }
  0xf6   : > { %2218 = vrot.lane.b32.xlu1 %v2217_v6, %s2475_s14  ;;  %v2870_v13 = vsel %vm3862_vm3, %v697_v35, %v698_v2  ;;  %v2106_v35 = vld [vmem:[%s3852_s3 + $0x10] sm:$0xff]  ;;  %v2895_v61 = vsel %vm3881_vm2, %v664_v34, %v665_v26  ;;  %v2105_v34 = vld [vmem:[%s3852_s3 + $0x8] sm:$0xff] }
  0xf7   : > { %1036 = vmatpush.bf16.msra.mxu1 %v2106_v35  ;;  %v459_v35 = vadd.s32 104, %v2615_v30 }
  0xf9   : > { %v435_v23 = vpop.f32.mrf.mxu0  ;;  %v557_v15 = vand.u32 15, %v459_v35 }
  0xfa   : > { %v2881_v37 = vadd.f32 %v2613_v28, %v435_v23 }
  0xfb   : > { %1037 = vmatpush.bf16.msra.mxu1 %v2105_v34  ;;  %vm2941_vm0 = vcmp.eq.s32.totalorder %v557_v15, 15 }
  0xfc   : > { %3912 = vst [vmem:[#allocation10_spill] sm:$0xff] %v2881_v37  ;;  %v666_v43 = vrot.slane %v2881_v37, 7  ;;  %v699_v52 = vrot.slane %v2881_v37, 1  ;;  %v3920_v51 = vsel %vm2941_vm0, 4294967295, %v3919_v51 }
  0xfe   : > { %v707_v57 = vsel %vm3862_vm3, %v698_v2, %v699_v52  ;;  %v2901_v6 = vsel %vm3881_vm2, %v665_v26, %v666_v43 }
  0xff   : > { %v779_v8 = vsel %vm2888_vm14, %v2895_v61, %v707_v57  ;;  %v2104_v57 = vld [vmem:[%s3852_s3] sm:$0xff] }
 0x100   : > { %v2222_v10 = vpack.i.bf16 %v779_v8, %v2870_v13  ;;  %1038 = vmatpush.bf16.msra.mxu1 %v2104_v57 }
 0x101   : > { %v437_v23 = vpop.f32.mrf.mxu0 }
 0x102   : > { %v2911_v24 = vadd.f32 %v2613_v28, %v437_v23  ;;  %2223 = vrot.lane.b32.xlu2 %v2222_v10, %s2476_s16  ;;  %v461_v10 = vadd.s32 120, %v2615_v30 }
 0x104   : > { %3915 = vst [vmem:[#allocation11_spill] sm:$0xff] %v2911_v24  ;;  %v700_v2 = vrot.slane %v2911_v24, 1  ;;  %v2227_v26 = vpack.i.bf16 %v2911_v24, %v2881_v37  ;;  %v667_v34 = vrot.slane %v2911_v24, 7  ;;  %v571_v41 = vand.u32 15, %v461_v10 }
 0x106   : > { %2228 = vrot.lane.b32.xlu0 %v2227_v26, %s2475_s14  ;;  %v2928_v8 = vsel %vm3862_vm3, %v699_v52, %v700_v2  ;;  %v2948_v35 = vsel %vm3881_vm2, %v666_v43, %v667_v34 }
 0x109   : > { %v440_v23 = vpop.f32.mrf.mxu0 }
 0x10a   : > { %v2936_v14 = vadd.f32 %v2613_v28, %v440_v23 }
 0x10c   : > { %3918 = vst [vmem:[#allocation12_spill] sm:$0xff] %v2936_v14  ;;  %v668_v26 = vrot.slane %v2936_v14, 7  ;;  %v701_v52 = vrot.slane %v2936_v14, 1 }
 0x10e   : > { %v705_v57 = vsel %vm3862_vm3, %v700_v2, %v701_v52  ;;  %v2954_v23 = vsel %vm3881_vm2, %v667_v34, %v668_v26  ;;  %vm2972_vm3 = vcmp.eq.s32.totalorder %v571_v41, 15 }
 0x10f   : > { %v781_v15 = vsel %vm2941_vm0, %v2948_v35, %v705_v57  ;;  %v3924_v57 = vmov 0  ;;  %vm3926_vm0 = vcmp.lt.s32.totalorder %v2615_v30, 7 }
 0x110   : > { %v2232_v60 = vpack.i.bf16 %v781_v15, %v2928_v8  ;;  %v3925_v57 = vsel %vm2972_vm3, 4294967295, %v3924_v57  ;;  %vm3928_vm14 = vmmov %vm3926_vm0  ;;  %v466_v15 = vand.u32 15, %v2615_v30 }
 0x111   : > { %v442_v45 = vpop.f32.mrf.mxu0 }
 0x112   : > { %v2961_v24 = vadd.f32 %v2613_v28, %v442_v45  ;;  %2233 = vrot.lane.b32.xlu1 %v2232_v60, %s2476_s16  ;;  %v3927_v60 = vrot.slane %v2618_v31, 1 }
 0x114   : > { %3921 = vst [vmem:[#allocation13_spill] sm:$0xff] %v2961_v24  ;;  %v669_v2 = vrot.slane %v2961_v24, 7  ;;  %v702_v34 = vrot.slane %v2961_v24, 1  ;;  %v2237_v21 = vpack.i.bf16 %v2961_v24, %v2936_v14  ;;  %v3931_v24 = vrot.slane %v2618_v31, 7 }
 0x116   : > { %2238 = vrot.lane.b32.xlu2 %v2237_v21, %s2475_s14  ;;  %v2979_v28 = vsel %vm3881_vm2, %v668_v26, %v669_v2  ;;  %v2983_v45 = vsel %vm3926_vm0, %v701_v52, %v702_v34  ;;  %v719_v18 = vsel %vm3928_vm14, %v702_v34, %v3927_v60  ;;  %vm2999_vm0 = vcmp.eq.s32.totalorder %v466_v15, 0 }
 0x117   : > { %v783_v10 = vsel %vm2972_vm3, %v2979_v28, %v719_v18  ;;  %v3929_v21 = vmov 0  ;;  %v686_v41 = vsel %vm3881_vm2, %v669_v2, %v3931_v24  ;;  %vm3880_vm14 = vcmask 261120  }
 0x118   : > { %v2242_v26 = vpack.i.bf16 %v783_v10, %v2983_v45  ;;  %v2169_v52 = vpop.permute.xlu0 %2168  ;;  %v3930_v21 = vsel %vm2999_vm0, 4294967295, %v3929_v21  ;;  %vm3879_vm3 = vcmask 523264   ;;  %v736_v10 = vsel %vm2999_vm0, %v2659_v49, %v686_v41 }
 0x119   : > { %v2171_v34 = vunpack.i.h.bf16 %v2169_v52  ;;  %v2170_v60 = vunpack.i.l.bf16 %v2169_v52 }
 0x11a   : > { %2243 = vrot.lane.b32.xlu0 %v2242_v26, %s2476_s16 }
 0x11b   : > { %v913_v15 = vsel %vm3880_vm14, %v736_v10, %v2170_v60  ;;  %v914_v37 = vsel %vm3880_vm14, %v2647_v46, %v2171_v34  ;;  %v3932_v46 = vsel %vm2673_vm5, %v2680_v59, %v2653_v48  ;;  %v3933_v48 = vsel %vm2719_vm7, %v2726_v17, %v2705_v7 }
 0x11c   : > { %v3934_v17 = vsel %vm2765_vm9, %v2772_v50, %v2751_v33  ;;  %v3935_v33 = vsel %vm2811_vm11, %v2818_v20, %v2797_v4  ;;  %v3936_v4 = vsel %vm2860_vm13, %v2870_v13, %v2843_v44  ;;  %v3937_v13 = vsel %vm2918_vm15, %v2928_v8, %v2901_v6 }
 0x11d   : > { %v3938_v6 = vsel %vm2964_vm1, %v2983_v45, %v2954_v23 }
 0x124   : > { %v2174_v18 = vpop.permute.xlu0 %2173 }
 0x125   : > { %v2176_v26 = vunpack.i.h.bf16 %v2174_v18  ;;  %v2175_v14 = vunpack.i.l.bf16 %v2174_v18  ;;  %v2189_v18 = vpop.permute.xlu2 %2188 }
 0x127   : > { %v930_v52 = vsel %vm3879_vm3, %v913_v15, %v2175_v14  ;;  %v931_v63 = vsel %vm3879_vm3, %v914_v37, %v2176_v26  ;;  %v2190_v26 = vunpack.i.l.bf16 %v2189_v18 }
 0x128   : > { %v946_v24 = vpack.c.bf16 %v931_v63, %v930_v52  ;;  %v2179_v2 = vpop.permute.xlu1 %2178 }
 0x129   : > { %v2181_v29 = vunpack.i.h.bf16 %v2179_v2  ;;  %v2180_v11 = vunpack.i.l.bf16 %v2179_v2  ;;  %v917_v59 = vsel %vm3880_vm14, %v3933_v48, %v2190_v26 }
 0x12a   : > { %2025 = vmatmul.msk.bf16.vlgmr.msra.gmra.mxu1 %vm3878_vm12, %v946_v24 }
 0x12b   : > { %v915_v14 = vsel %vm3880_vm14, %v3932_v46, %v2180_v11  ;;  %v916_v37 = vsel %vm3880_vm14, %v2699_v5, %v2181_v29 }
 0x12d   : > { %v2194_v10 = vpop.permute.xlu2 %2193 }
 0x12e   : > { %v2196_v15 = vunpack.i.h.bf16 %v2194_v10  ;;  %v2195_v52 = vunpack.i.l.bf16 %v2194_v10 }
 0x130   : > { %v934_v11 = vsel %vm3879_vm3, %v917_v59, %v2195_v52 }
 0x134   : > { %v2184_v56 = vpop.permute.xlu1 %2183 }
 0x135   : > { %v2186_v49 = vunpack.i.h.bf16 %v2184_v56  ;;  %v2185_v41 = vunpack.i.l.bf16 %v2184_v56  ;;  %v2191_v56 = vunpack.i.h.bf16 %v2189_v18 }
 0x137   : > { %v932_v63 = vsel %vm3879_vm3, %v915_v14, %v2185_v41  ;;  %v933_v34 = vsel %vm3879_vm3, %v916_v37, %v2186_v49  ;;  %v918_v5 = vsel %vm3880_vm14, %v2745_v27, %v2191_v56 }
 0x138   : > { %v947_v60 = vpack.c.bf16 %v933_v34, %v932_v63  ;;  %v935_v29 = vsel %vm3879_vm3, %v918_v5, %v2196_v15 }
 0x139   : > { %v948_v24 = vpack.c.bf16 %v935_v29, %v934_v11 }
 0x13a   : > { %2026 = vmatmul.msk.bf16.gmra.mxu1 %vm3878_vm12, %v947_v60 }
 0x140   : > { %v2209_v60 = vpop.permute.xlu2 %2208 }
 0x141   : > { %v2211_v10 = vunpack.i.h.bf16 %v2209_v60  ;;  %v2210_v56 = vunpack.i.l.bf16 %v2209_v60 }
 0x143   : > { %v922_v52 = vsel %vm3880_vm14, %v2837_v42, %v2211_v10  ;;  %v921_v50 = vsel %vm3880_vm14, %v3935_v33, %v2210_v56 }
 0x148   : > { %v2199_v2 = vpop.permute.xlu0 %2198 }
 0x149   : > { %v2201_v49 = vunpack.i.h.bf16 %v2199_v2  ;;  %v2200_v41 = vunpack.i.l.bf16 %v2199_v2 }
 0x14a   : > { %2027 = vmatmul.msk.bf16.gmra.mxu1 %vm3878_vm12, %v948_v24 }
 0x14b   : > { %v920_v7 = vsel %vm3880_vm14, %v2791_v1, %v2201_v49  ;;  %v919_v27 = vsel %vm3880_vm14, %v3934_v17, %v2200_v41 }
 0x154   : > { %v2204_v18 = vpop.permute.xlu1 %2203 }
 0x155   : > { %v2206_v46 = vunpack.i.h.bf16 %v2204_v18  ;;  %v2205_v14 = vunpack.i.l.bf16 %v2204_v18 }
 0x157   : > { %v936_v37 = vsel %vm3879_vm3, %v919_v27, %v2205_v14  ;;  %v937_v63 = vsel %vm3879_vm3, %v920_v7, %v2206_v46 }
 0x158   : > { %v949_v34 = vpack.c.bf16 %v937_v63, %v936_v37 }
 0x15a   : > { %2028 = vmatmul.msk.bf16.gmra.mxu1 %vm3878_vm12, %v949_v34 }
 0x15c   : > { %v2224_v2 = vpop.permute.xlu2 %2223 }
 0x15d   : > { %v2226_v49 = vunpack.i.h.bf16 %v2224_v2  ;;  %v2225_v41 = vunpack.i.l.bf16 %v2224_v2 }
 0x164   : > { %v2214_v26 = vpop.permute.xlu0 %2213 }
 0x165   : > { %v2216_v15 = vunpack.i.h.bf16 %v2214_v26  ;;  %v2215_v1 = vunpack.i.l.bf16 %v2214_v26 }
 0x167   : > { %v938_v48 = vsel %vm3879_vm3, %v921_v50, %v2215_v1  ;;  %v939_v59 = vsel %vm3879_vm3, %v922_v52, %v2216_v15 }
 0x168   : > { %v950_v5 = vpack.c.bf16 %v939_v59, %v938_v48  ;;  %v2219_v11 = vpop.permute.xlu1 %2218 }
 0x169   : > { %v2221_v29 = vunpack.i.h.bf16 %v2219_v11  ;;  %v2220_v24 = vunpack.i.l.bf16 %v2219_v11 }
 0x16a   : > { %2029 = vmatmul.msk.bf16.gmra.mxu1 %vm3878_vm12, %v950_v5 }
 0x16b   : > { %v924_v42 = vsel %vm3880_vm14, %v2895_v61, %v2221_v29  ;;  %v923_v20 = vsel %vm3880_vm14, %v3936_v4, %v2220_v24  ;;  %v3096_v29 = vld [vmem:[%s3853_s4] ss:$0 sm:$0xff] }
 0x16c   : > { %v940_v18 = vsel %vm3879_vm3, %v923_v20, %v2225_v41  ;;  %v941_v46 = vsel %vm3879_vm3, %v924_v42, %v2226_v49 }
 0x16d   : > { %v951_v14 = vpack.c.bf16 %v941_v46, %v940_v18 }
 0x170   : > { %v2239_v26 = vpop.permute.xlu2 %2238 }
 0x171   : > { %v2241_v1 = vunpack.i.h.bf16 %v2239_v26  ;;  %v2240_v52 = vunpack.i.l.bf16 %v2239_v26 }
 0x173   : > { %v928_v50 = vsel %vm3880_vm14, %v2979_v28, %v2241_v1  ;;  %v927_v8 = vsel %vm3880_vm14, %v3938_v6, %v2240_v52 }
 0x178   : > { %v2229_v7 = vpop.permute.xlu0 %2228 }
 0x179   : > { %v2231_v17 = vunpack.i.h.bf16 %v2229_v7  ;;  %v2230_v27 = vunpack.i.l.bf16 %v2229_v7 }
 0x17a   : > { %2030 = vmatmul.msk.bf16.gmra.mxu1 %vm3878_vm12, %v951_v14 }
 0x17b   : > { %v926_v44 = vsel %vm3880_vm14, %v2948_v35, %v2231_v17  ;;  %v925_v34 = vsel %vm3880_vm14, %v3937_v13, %v2230_v27  ;;  %vm3946_vm14 = vnez %v3914_v53 }
 0x184   : > { %v2234_v61 = vpop.permute.xlu1 %2233 }
 0x185   : > { %v2236_v37 = vunpack.i.h.bf16 %v2234_v61  ;;  %v2235_v63 = vunpack.i.l.bf16 %v2234_v61 }
 0x187   : > { %v942_v60 = vsel %vm3879_vm3, %v925_v34, %v2235_v63  ;;  %v943_v10 = vsel %vm3879_vm3, %v926_v44, %v2236_v37 }
 0x188   : > { %v952_v56 = vpack.c.bf16 %v943_v10, %v942_v60 }
 0x18a   : > { %2031 = vmatmul.msk.bf16.gmra.mxu1 %vm3878_vm12, %v952_v56 }
 0x18c   : > { %v2244_v15 = vpop.permute.xlu0 %2243 }
 0x18d   : > { %v2246_v33 = vunpack.i.h.bf16 %v2244_v15  ;;  %v2245_v35 = vunpack.i.l.bf16 %v2244_v15 }
 0x18f   : > { %v944_v48 = vsel %vm3879_vm3, %v927_v8, %v2245_v35  ;;  %v945_v59 = vsel %vm3879_vm3, %v928_v50, %v2246_v33 }
 0x190   : > { %v953_v5 = vpack.c.bf16 %v945_v59, %v944_v48 }
 0x19a   : > { %2032 = vmatmul.msk.bf16.gmra.mxu1 %vm3878_vm12, %v953_v5  ;;  %vm3939_vm12 = vcmp.lt.s32.totalorder %v2615_v30, 7 }
 0x19b   : > { %vm3940_vm3 = vmmov %vm3939_vm12 }
 0x1a7   : > { %v1040_v11 = vpop.f32.mrf.mxu1 }
 0x1a8   : > { %v1041_v28 = vadd.f32 %v3096_v29, %v1040_v11 }
 0x1aa   : > { %v3100_v45 = vmax.f32 %v1041_v28, 0.0 }
 0x1ac   : > { %v1096_v46 = vrot.slane %v3100_v45, 7  ;;  %v1128_v17 = vrot.slane %v3100_v45, 1 }
 0x1af   : > { %v1042_v24 = vpop.f32.mrf.mxu1 }
 0x1b0   : > { %v1043_v23 = vadd.f32 %v3096_v29, %v1042_v24 }
 0x1b2   : > { %v1081_v2 = vmax.f32 %v1043_v23, 0.0 }
 0x1b4   : > { %v2247_v42 = vpack.i.bf16 %v1081_v2, %v3100_v45  ;;  %v1097_v49 = vrot.slane %v1081_v2, 7  ;;  %v1129_v18 = vrot.slane %v1081_v2, 1 }
 0x1b6   : > { %2248 = vrot.lane.b32.xlu1 %v2247_v42, %s2475_s14  ;;  %v3111_v27 = vsel %vm3881_vm2, %v1096_v46, %v1097_v49  ;;  %v3123_v44 = vsel %vm3940_vm3, %v1128_v17, %v1129_v18 }
 0x1b7   : > { %v1045_v4 = vpop.f32.mrf.mxu1 }
 0x1b8   : > { %v1046_v20 = vadd.f32 %v3096_v29, %v1045_v4 }
 0x1ba   : > { %v1082_v41 = vmax.f32 %v1046_v20, 0.0 }
 0x1bc   : > { %v1098_v14 = vrot.slane %v1082_v41, 7  ;;  %v1130_v7 = vrot.slane %v1082_v41, 1 }
 0x1be   : > { %v1157_v61 = vsel %vm3939_vm12, %v1129_v18, %v1130_v7  ;;  %v3117_v37 = vsel %vm3881_vm2, %v1097_v49, %v1098_v14  ;;  %vm3941_vm12 = vmmov %vm3940_vm3 }
 0x1bf   : > { %v1047_v63 = vpop.f32.mrf.mxu1  ;;  %v1177_v13 = vsel %vm2634_vm4, %v3111_v27, %v1157_v61 }
 0x1c0   : > { %v1048_v34 = vadd.f32 %v3096_v29, %v1047_v63  ;;  %v2252_v60 = vpack.i.bf16 %v1177_v13, %v3123_v44 }
 0x1c2   : > { %v1083_v10 = vmax.f32 %v1048_v34, 0.0  ;;  %2253 = vrot.lane.b32.xlu2 %v2252_v60, %s2476_s16 }
 0x1c4   : > { %v1131_v56 = vrot.slane %v1083_v10, 1  ;;  %v2257_v26 = vpack.i.bf16 %v1083_v10, %v1082_v41  ;;  %v1099_v35 = vrot.slane %v1083_v10, 7 }
 0x1c6   : > { %2258 = vrot.lane.b32.xlu0 %v2257_v26, %s2475_s14  ;;  %v3134_v15 = vsel %vm3941_vm12, %v1130_v7, %v1131_v56  ;;  %v3143_v48 = vsel %vm3881_vm2, %v1098_v14, %v1099_v35  ;;  %vm3942_vm12 = vmmov %vm3940_vm3 }
 0x1c7   : > { %v1050_v1 = vpop.f32.mrf.mxu1 }
 0x1c8   : > { %v1051_v33 = vadd.f32 %v3096_v29, %v1050_v1 }
 0x1ca   : > { %v1084_v50 = vmax.f32 %v1051_v33, 0.0 }
 0x1cc   : > { %v1100_v6 = vrot.slane %v1084_v50, 7  ;;  %v1132_v8 = vrot.slane %v1084_v50, 1 }
 0x1ce   : > { %v1155_v59 = vsel %vm3940_vm3, %v1131_v56, %v1132_v8  ;;  %v3149_v5 = vsel %vm3881_vm2, %v1099_v35, %v1100_v6 }
 0x1cf   : > { %v1052_v11 = vpop.f32.mrf.mxu1  ;;  %v1179_v28 = vsel %vm2692_vm6, %v3143_v48, %v1155_v59 }
 0x1d0   : > { %v1053_v24 = vadd.f32 %v3096_v29, %v1052_v11  ;;  %v2262_v23 = vpack.i.bf16 %v1179_v28, %v3134_v15 }
 0x1d2   : > { %v1085_v2 = vmax.f32 %v1053_v24, 0.0  ;;  %2263 = vrot.lane.b32.xlu1 %v2262_v23, %s2476_s16 }
 0x1d4   : > { %v1133_v42 = vrot.slane %v1085_v2, 1  ;;  %v2267_v4 = vpack.i.bf16 %v1085_v2, %v1084_v50  ;;  %v1101_v14 = vrot.slane %v1085_v2, 7 }
 0x1d6   : > { %2268 = vrot.lane.b32.xlu2 %v2267_v4, %s2475_s14  ;;  %v3160_v20 = vsel %vm3942_vm12, %v1132_v8, %v1133_v42  ;;  %v3169_v13 = vsel %vm3881_vm2, %v1100_v6, %v1101_v14  ;;  %vm3943_vm12 = vmmov %vm3940_vm3 }
 0x1d7   : > { %v1055_v49 = vpop.f32.mrf.mxu1 }
 0x1d8   : > { %v1056_v18 = vadd.f32 %v3096_v29, %v1055_v49 }
 0x1da   : > { %v1086_v7 = vmax.f32 %v1056_v18, 0.0 }
 0x1dc   : > { %v1102_v61 = vrot.slane %v1086_v7, 7  ;;  %v1134_v63 = vrot.slane %v1086_v7, 1 }
 0x1de   : > { %v1153_v34 = vsel %vm3940_vm3, %v1133_v42, %v1134_v63  ;;  %v3175_v60 = vsel %vm3881_vm2, %v1101_v14, %v1102_v61 }
 0x1df   : > { %v1057_v10 = vpop.f32.mrf.mxu1  ;;  %v1181_v56 = vsel %vm2738_vm8, %v3169_v13, %v1153_v34 }
 0x1e0   : > { %v1058_v26 = vadd.f32 %v3096_v29, %v1057_v10  ;;  %v2272_v1 = vpack.i.bf16 %v1181_v56, %v3160_v20 }
 0x1e2   : > { %v1087_v33 = vmax.f32 %v1058_v26, 0.0  ;;  %2273 = vrot.lane.b32.xlu0 %v2272_v1, %s2476_s16  ;;  %v2115_v26 = vld [vmem:[%s3854_s5 + $0x28] sm:$0xff] }
 0x1e3   : > { %1438 = vmatpush.bf16.msra.mxu2 %v2115_v26 }
 0x1e4   : > { %v1135_v35 = vrot.slane %v1087_v33, 1  ;;  %v2277_v50 = vpack.i.bf16 %v1087_v33, %v1086_v7  ;;  %v1103_v28 = vrot.slane %v1087_v33, 7 }
 0x1e6   : > { %2278 = vrot.lane.b32.xlu1 %v2277_v50, %s2475_s14  ;;  %v3186_v6 = vsel %vm3943_vm12, %v1134_v63, %v1135_v35  ;;  %v3195_v42 = vsel %vm3881_vm2, %v1102_v61, %v1103_v28  ;;  %vm3944_vm12 = vmmov %vm3940_vm3 }
 0x1e7   : > { %v1060_v8 = vpop.f32.mrf.mxu1 }
 0x1e8   : > { %v1061_v11 = vadd.f32 %v3096_v29, %v1060_v8 }
 0x1ea   : > { %v1088_v24 = vmax.f32 %v1061_v11, 0.0  ;;  %v2114_v11 = vld [vmem:[%s3854_s5 + $0x20] sm:$0xff] }
 0x1eb   : > { %1439 = vmatpush.bf16.msra.mxu2 %v2114_v11 }
 0x1ec   : > { %v1104_v23 = vrot.slane %v1088_v24, 7  ;;  %v1136_v2 = vrot.slane %v1088_v24, 1 }
 0x1ee   : > { %v1151_v4 = vsel %vm3940_vm3, %v1135_v35, %v1136_v2  ;;  %v3201_v49 = vsel %vm3881_vm2, %v1103_v28, %v1104_v23 }
 0x1ef   : > { %v1062_v18 = vpop.f32.mrf.mxu1  ;;  %v1183_v14 = vsel %vm2784_vm10, %v3195_v42, %v1151_v4  ;;  %vm3955_vm10 = vcmask 785408  }
 0x1f0   : > { %v1063_v7 = vadd.f32 %v3096_v29, %v1062_v18  ;;  %v2282_v63 = vpack.i.bf16 %v1183_v14, %v3186_v6  ;;  %v2113_v14 = vld [vmem:[%s3854_s5 + $0x18] sm:$0xff] }
 0x1f1   : > { %1440 = vmatpush.bf16.msra.mxu2 %v2113_v14 }
 0x1f2   : > { %v1089_v34 = vmax.f32 %v1063_v7, 0.0  ;;  %2283 = vrot.lane.b32.xlu2 %v2282_v63, %s2476_s16 }
 0x1f4   : > { %v1137_v61 = vrot.slane %v1089_v34, 1  ;;  %v2287_v10 = vpack.i.bf16 %v1089_v34, %v1088_v24  ;;  %v1105_v50 = vrot.slane %v1089_v34, 7 }
 0x1f6   : > { %2288 = vrot.lane.b32.xlu0 %v2287_v10, %s2475_s14  ;;  %v3212_v56 = vsel %vm3944_vm12, %v1136_v2, %v1137_v61  ;;  %v3227_v2 = vsel %vm3881_vm2, %v1104_v23, %v1105_v50  ;;  %vm3945_vm12 = vnez %v3908_v36 }
 0x1f7   : > { %v1065_v1 = vpop.f32.mrf.mxu1 }
 0x1f8   : > { %v1066_v35 = vadd.f32 %v3096_v29, %v1065_v1 }
 0x1fa   : > { %v1090_v8 = vmax.f32 %v1066_v35, 0.0 }
 0x1fc   : > { %v1106_v28 = vrot.slane %v1090_v8, 7  ;;  %v1138_v24 = vrot.slane %v1090_v8, 1 }
 0x1fe   : > { %v1149_v4 = vsel %vm3940_vm3, %v1137_v61, %v1138_v24  ;;  %v3233_v18 = vsel %vm3881_vm2, %v1105_v50, %v1106_v28  ;;  %v2112_v61 = vld [vmem:[%s3854_s5 + $0x10] sm:$0xff]  ;;  %v2111_v50 = vld [vmem:[%s3854_s5 + $0x8] sm:$0xff] }
 0x1ff   : > { %v1067_v7 = vpop.f32.mrf.mxu1  ;;  %v1185_v63 = vsel %vm3945_vm12, %v3227_v2, %v1149_v4  ;;  %1441 = vmatpush.bf16.msra.mxu2 %v2112_v61  ;;  %vm3953_vm12 = vcmask 523264  }
 0x200   : > { %v1068_v34 = vadd.f32 %v3096_v29, %v1067_v7  ;;  %v2292_v23 = vpack.i.bf16 %v1185_v63, %v3212_v56 }
 0x202   : > { %v1091_v10 = vmax.f32 %v1068_v34, 0.0  ;;  %2293 = vrot.lane.b32.xlu1 %v2292_v23, %s2476_s16 }
 0x203   : > { %1442 = vmatpush.bf16.msra.mxu2 %v2111_v50 }
 0x204   : > { %v1139_v26 = vrot.slane %v1091_v10, 1  ;;  %v2297_v1 = vpack.i.bf16 %v1091_v10, %v1090_v8  ;;  %v1107_v8 = vrot.slane %v1091_v10, 7 }
 0x206   : > { %2298 = vrot.lane.b32.xlu2 %v2297_v1, %s2475_s14  ;;  %v3250_v35 = vsel %vm3940_vm3, %v1138_v24, %v1139_v26  ;;  %v2110_v24 = vld [vmem:[%s3854_s5] sm:$0xff]  ;;  %v3265_v23 = vsel %vm3881_vm2, %v1106_v28, %v1107_v8 }
 0x207   : > { %v1070_v11 = vpop.f32.mrf.mxu1  ;;  %1443 = vmatpush.bf16.msra.mxu2 %v2110_v24 }
 0x208   : > { %v1071_v14 = vadd.f32 %v3096_v29, %v1070_v11 }
 0x20a   : > { %v1092_v7 = vmax.f32 %v1071_v14, 0.0 }
 0x20c   : > { %v1108_v63 = vrot.slane %v1092_v7, 7  ;;  %v1140_v34 = vrot.slane %v1092_v7, 1 }
 0x20e   : > { %v1147_v61 = vsel %vm3940_vm3, %v1139_v26, %v1140_v34  ;;  %v3271_v1 = vsel %vm3881_vm2, %v1107_v8, %v1108_v63 }
 0x20f   : > { %v1072_v10 = vpop.f32.mrf.mxu1  ;;  %v1187_v50 = vsel %vm3946_vm14, %v3265_v23, %v1147_v61  ;;  %vm3947_vm14 = vmmov %vm3940_vm3 }
 0x210   : > { %v1073_v11 = vadd.f32 %v3096_v29, %v1072_v10  ;;  %v2302_v14 = vpack.i.bf16 %v1187_v50, %v3250_v35 }
 0x212   : > { %v1093_v24 = vmax.f32 %v1073_v11, 0.0  ;;  %2303 = vrot.lane.b32.xlu0 %v2302_v14, %s2476_s16 }
 0x214   : > { %v1141_v28 = vrot.slane %v1093_v24, 1  ;;  %v2307_v4 = vpack.i.bf16 %v1093_v24, %v1092_v7  ;;  %v1109_v50 = vrot.slane %v1093_v24, 7 }
 0x216   : > { %2308 = vrot.lane.b32.xlu1 %v2307_v4, %s2475_s14  ;;  %v3282_v26 = vsel %vm3940_vm3, %v1140_v34, %v1141_v28  ;;  %v3291_v7 = vsel %vm3881_vm2, %v1108_v63, %v1109_v50  ;;  %vm3948_vm3 = vnez %v3920_v51 }
 0x217   : > { %v1075_v8 = vpop.f32.mrf.mxu1 }
 0x218   : > { %v1076_v10 = vadd.f32 %v3096_v29, %v1075_v8 }
 0x21a   : > { %v1094_v11 = vmax.f32 %v1076_v10, 0.0 }
 0x21c   : > { %v1110_v33 = vrot.slane %v1094_v11, 7  ;;  %v1142_v14 = vrot.slane %v1094_v11, 1 }
 0x21e   : > { %v1145_v4 = vsel %vm3947_vm14, %v1141_v28, %v1142_v14  ;;  %v3297_v34 = vsel %vm3881_vm2, %v1109_v50, %v1110_v33 }
 0x21f   : > { %v1077_v59 = vpop.f32.mrf.mxu1  ;;  %v1189_v8 = vsel %vm3948_vm3, %v3291_v7, %v1145_v4  ;;  %vm3949_vm3 = vmmov %vm3947_vm14 }
 0x220   : > { %v1078_v24 = vadd.f32 %v3096_v29, %v1077_v59  ;;  %v2312_v10 = vpack.i.bf16 %v1189_v8, %v3282_v26  ;;  %v2254_v59 = vpop.permute.xlu2 %2253 }
 0x221   : > { %v2255_v8 = vunpack.i.l.bf16 %v2254_v59 }
 0x222   : > { %v1095_v61 = vmax.f32 %v1078_v24, 0.0  ;;  %2313 = vrot.lane.b32.xlu2 %v2312_v10, %s2476_s16 }
 0x224   : > { %v1111_v63 = vrot.slane %v1095_v61, 7  ;;  %v1143_v41 = vrot.slane %v1095_v61, 1  ;;  %v2317_v52 = vpack.i.bf16 %v1095_v61, %v1094_v11 }
 0x226   : > { %2318 = vrot.lane.b32.xlu0 %v2317_v52, %s2475_s14  ;;  %v3308_v28 = vsel %vm3881_vm2, %v1110_v33, %v1111_v63  ;;  %v3312_v50 = vsel %vm3947_vm14, %v1142_v14, %v1143_v41  ;;  %v1159_v29 = vsel %vm3949_vm3, %v1143_v41, %v1128_v17  ;;  %v1127_v61 = vsel %vm3881_vm2, %v1111_v63, %v1096_v46 }
 0x227   : > { %vm3950_vm14 = vnez %v3925_v57  ;;  %v2256_v41 = vunpack.i.h.bf16 %v2254_v59  ;;  %v1160_v45 = vsel %vm2999_vm0, %v3123_v44, %v1127_v61  ;;  %vm3951_vm3 = vcmask 261120  }
 0x228   : > { %v1191_v33 = vsel %vm3950_vm14, %v3308_v28, %v1159_v29  ;;  %v2249_v11 = vpop.permute.xlu1 %2248  ;;  %vm3952_vm2 = vmmov %vm3951_vm3  ;;  %v3956_v61 = vsel %vm2673_vm5, %v3134_v15, %v3117_v37  ;;  %v3960_v15 = vsel %vm2719_vm7, %v3160_v20, %v3149_v5  ;;  %v3965_v5 = vsel %vm2765_vm9, %v3186_v6, %v3175_v60 }
 0x229   : > { %v2322_v14 = vpack.i.bf16 %v1191_v33, %v3312_v50  ;;  %v2251_v4 = vunpack.i.h.bf16 %v2249_v11  ;;  %v2250_v17 = vunpack.i.l.bf16 %v2249_v11  ;;  %vm3954_vm14 = vmmov %vm3953_vm12  ;;  %v3970_v6 = vsel %vm2811_vm11, %v3212_v56, %v3201_v49 }
 0x22a   : > { %vm3959_vm0 = vmmov %vm3952_vm2  ;;  %v3975_v49 = vsel %vm2860_vm13, %v3250_v35, %v3233_v18  ;;  %v3981_v18 = vsel %vm2918_vm15, %v3282_v26, %v3271_v1  ;;  %v3986_v26 = vsel %vm2964_vm1, %v3312_v50, %v3297_v34 }
 0x22b   : > { %2323 = vrot.lane.b32.xlu1 %v2322_v14, %s2476_s16  ;;  %v1320_v46 = vsel %vm3951_vm3, %v1160_v45, %v2250_v17  ;;  %v1321_v24 = vsel %vm3952_vm2, %v3111_v27, %v2251_v4  ;;  %vm3957_vm3 = vmmov %vm3952_vm2 }
 0x22c   : > { %v1336_v10 = vsel %vm3953_vm12, %v1320_v46, %v2255_v8  ;;  %v1337_v63 = vsel %vm3954_vm14, %v1321_v24, %v2256_v41  ;;  %vm3958_vm14 = vmmov %vm3953_vm12 }
 0x22d   : > { %v1352_v29 = vpack.c.bf16 %v1337_v63, %v1336_v10 }
 0x22f   : > { %2057 = vmatmul.msk.bf16.vlgmr.msra.gmra.mxu2 %vm3955_vm10, %v1352_v29 }
 0x230   : > { %v2269_v8 = vpop.permute.xlu2 %2268 }
 0x231   : > { %v2271_v45 = vunpack.i.h.bf16 %v2269_v8 }
 0x233   : > { %v1325_v37 = vsel %vm3959_vm0, %v3169_v13, %v2271_v45 }
 0x238   : > { %v2259_v33 = vpop.permute.xlu0 %2258 }
 0x239   : > { %v2261_v59 = vunpack.i.h.bf16 %v2259_v33  ;;  %v2260_v11 = vunpack.i.l.bf16 %v2259_v33 }
 0x23b   : > { %v1322_v27 = vsel %vm3957_vm3, %v3956_v61, %v2260_v11  ;;  %v1323_v14 = vsel %vm3952_vm2, %v3143_v48, %v2261_v59  ;;  %vm3961_vm3 = vmmov %vm3959_vm0 }
 0x23c   : > { %vm3962_vm2 = vmmov %vm3953_vm12 }
 0x244   : > { %v2264_v52 = vpop.permute.xlu1 %2263 }
 0x245   : > { %v2266_v39 = vunpack.i.h.bf16 %v2264_v52  ;;  %v2265_v44 = vunpack.i.l.bf16 %v2264_v52  ;;  %v2270_v52 = vunpack.i.l.bf16 %v2269_v8 }
 0x247   : > { %v1338_v4 = vsel %vm3953_vm12, %v1322_v27, %v2265_v44  ;;  %v1339_v17 = vsel %vm3958_vm14, %v1323_v14, %v2266_v39  ;;  %v1324_v48 = vsel %vm3961_vm3, %v3960_v15, %v2270_v52  ;;  %vm3963_vm12 = vmmov %vm3962_vm2 }
 0x248   : > { %v1353_v41 = vpack.c.bf16 %v1339_v17, %v1338_v4  ;;  %vm3964_vm14 = vmmov %vm3955_vm10 }
 0x249   : > { %vm3967_vm3 = vmmov %vm3962_vm2 }
 0x24a   : > { %2058 = vmatmul.msk.bf16.gmra.mxu2 %vm3955_vm10, %v1353_v41  ;;  %vm3966_vm10 = vmmov %vm3959_vm0 }
 0x24c   : > { %v2284_v44 = vpop.permute.xlu2 %2283 }
 0x24d   : > { %v2286_v61 = vunpack.i.h.bf16 %v2284_v44  ;;  %v2285_v27 = vunpack.i.l.bf16 %v2284_v44 }
 0x254   : > { %v2274_v46 = vpop.permute.xlu0 %2273 }
 0x255   : > { %v2276_v24 = vunpack.i.h.bf16 %v2274_v46  ;;  %v2275_v10 = vunpack.i.l.bf16 %v2274_v46 }
 0x257   : > { %v1340_v39 = vsel %vm3962_vm2, %v1324_v48, %v2275_v10  ;;  %v1341_v63 = vsel %vm3963_vm12, %v1325_v37, %v2276_v24  ;;  %vm3968_vm12 = vmmov %vm3964_vm14 }
 0x258   : > { %v1354_v29 = vpack.c.bf16 %v1341_v63, %v1340_v39  ;;  %v2279_v33 = vpop.permute.xlu1 %2278 }
 0x259   : > { %v2281_v59 = vunpack.i.h.bf16 %v2279_v33  ;;  %v2280_v11 = vunpack.i.l.bf16 %v2279_v33 }
 0x25a   : > { %2059 = vmatmul.msk.bf16.gmra.mxu2 %vm3964_vm14, %v1354_v29  ;;  %vm3969_vm14 = vmmov %vm3959_vm0 }
 0x25b   : > { %v1327_v13 = vsel %vm3959_vm0, %v3195_v42, %v2281_v59  ;;  %v1326_v20 = vsel %vm3966_vm10, %v3965_v5, %v2280_v11  ;;  %vm3971_vm10 = vmmov %vm3962_vm2 }
 0x25c   : > { %v1342_v14 = vsel %vm3967_vm3, %v1326_v20, %v2285_v27  ;;  %v1343_v4 = vsel %vm3962_vm2, %v1327_v13, %v2286_v61  ;;  %vm3972_vm3 = vmmov %vm3962_vm2 }
 0x25d   : > { %v1355_v17 = vpack.c.bf16 %v1343_v4, %v1342_v14  ;;  %vm3973_vm2 = vmmov %vm3968_vm12 }
 0x260   : > { %v2299_v48 = vpop.permute.xlu2 %2298 }
 0x261   : > { %v2301_v39 = vunpack.i.h.bf16 %v2299_v48  ;;  %v2300_v63 = vunpack.i.l.bf16 %v2299_v48  ;;  %v3420_v48 = vld [vmem:[%s3855_s6] ss:$0 sm:$0xff] }
 0x268   : > { %v2289_v41 = vpop.permute.xlu0 %2288 }
 0x269   : > { %v2291_v8 = vunpack.i.h.bf16 %v2289_v41  ;;  %v2290_v45 = vunpack.i.l.bf16 %v2289_v41 }
 0x26a   : > { %2060 = vmatmul.msk.bf16.gmra.mxu2 %vm3968_vm12, %v1355_v17  ;;  %vm3974_vm12 = vmmov %vm3959_vm0 }
 0x26b   : > { %v1329_v60 = vsel %vm3969_vm14, %v3227_v2, %v2291_v8  ;;  %v1328_v24 = vsel %vm3959_vm0, %v3970_v6, %v2290_v45  ;;  %v1331_v59 = vsel %vm3974_vm12, %v3265_v23, %v2301_v39  ;;  %vm3976_vm14 = vmmov %vm3959_vm0 }
 0x26c   : > { %v1330_v56 = vsel %vm3976_vm14, %v3975_v49, %v2300_v63  ;;  %vm3977_vm0 = vmmov %vm3972_vm3 }
 0x26d   : > { %vm3983_vm14 = vmmov %vm3977_vm0 }
 0x274   : > { %v2294_v42 = vpop.permute.xlu1 %2293 }
 0x275   : > { %v2296_v52 = vunpack.i.h.bf16 %v2294_v42  ;;  %v2295_v46 = vunpack.i.l.bf16 %v2294_v42 }
 0x277   : > { %v1344_v10 = vsel %vm3971_vm10, %v1328_v24, %v2295_v46  ;;  %v1345_v37 = vsel %vm3972_vm3, %v1329_v60, %v2296_v52  ;;  %vm3978_vm10 = vmmov %vm3977_vm0 }
 0x278   : > { %v1356_v15 = vpack.c.bf16 %v1345_v37, %v1344_v10  ;;  %vm3979_vm3 = vmmov %vm3973_vm2 }
 0x27a   : > { %2061 = vmatmul.msk.bf16.gmra.mxu2 %vm3973_vm2, %v1356_v15  ;;  %vm3980_vm2 = vmmov %vm3974_vm12 }
 0x27b   : > { %vm3982_vm12 = vmmov %vm3980_vm2 }
 0x27c   : > { %v2314_v27 = vpop.permute.xlu2 %2313 }
 0x27d   : > { %v2316_v14 = vunpack.i.h.bf16 %v2314_v27  ;;  %v2315_v4 = vunpack.i.l.bf16 %v2314_v27 }
 0x284   : > { %v2304_v29 = vpop.permute.xlu0 %2303 }
 0x285   : > { %v2306_v33 = vunpack.i.h.bf16 %v2304_v29  ;;  %v2305_v2 = vunpack.i.l.bf16 %v2304_v29 }
 0x287   : > { %v1346_v11 = vsel %vm3977_vm0, %v1330_v56, %v2305_v2  ;;  %v1347_v44 = vsel %vm3978_vm10, %v1331_v59, %v2306_v33  ;;  %vm3984_vm10 = vmmov %vm3979_vm3 }
 0x288   : > { %v1357_v13 = vpack.c.bf16 %v1347_v44, %v1346_v11  ;;  %v2309_v5 = vpop.permute.xlu1 %2308 }
 0x289   : > { %v2311_v20 = vunpack.i.h.bf16 %v2309_v5  ;;  %v2310_v61 = vunpack.i.l.bf16 %v2309_v5 }
 0x28a   : > { %2062 = vmatmul.msk.bf16.gmra.mxu2 %vm3979_vm3, %v1357_v13  ;;  %vm3985_vm3 = vmmov %vm3980_vm2 }
 0x28b   : > { %v1333_v23 = vsel %vm3980_vm2, %v3291_v7, %v2311_v20  ;;  %v1332_v35 = vsel %vm3982_vm12, %v3981_v18, %v2310_v61  ;;  %vm3987_vm12 = vmmov %vm3977_vm0 }
 0x28c   : > { %v1348_v17 = vsel %vm3983_vm14, %v1332_v35, %v2315_v4  ;;  %v1349_v41 = vsel %vm3977_vm0, %v1333_v23, %v2316_v14  ;;  %vm3988_vm14 = vmmov %vm3977_vm0 }
 0x28d   : > { %v1358_v8 = vpack.c.bf16 %v1349_v41, %v1348_v17  ;;  %vm3989_vm0 = vmmov %vm3984_vm10 }
 0x298   : > { %v2319_v45 = vpop.permute.xlu0 %2318 }
 0x299   : > { %v2321_v52 = vunpack.i.h.bf16 %v2319_v45  ;;  %v2320_v7 = vunpack.i.l.bf16 %v2319_v45 }
 0x29a   : > { %2063 = vmatmul.msk.bf16.gmra.mxu2 %vm3984_vm10, %v1358_v8  ;;  %vm3990_vm10 = vcmp.lt.s32.totalorder %v2615_v30, 1 }
 0x29b   : > { %v1335_v1 = vsel %vm3985_vm3, %v3308_v28, %v2321_v52  ;;  %v1334_v6 = vsel %vm3980_vm2, %v3986_v26, %v2320_v7  ;;  %vm3991_vm3 = vcmp.lt.s32.totalorder %v2615_v30, 7  ;;  %vm3992_vm2 = vmmov %vm3990_vm10 }
 0x29d   : > { %v2324_v42 = vpop.permute.xlu1 %2323 }
 0x29e   : > { %v2326_v46 = vunpack.i.h.bf16 %v2324_v42  ;;  %v2325_v60 = vunpack.i.l.bf16 %v2324_v42 }
 0x2a0   : > { %v1350_v24 = vsel %vm3987_vm12, %v1334_v6, %v2325_v60  ;;  %v1351_v10 = vsel %vm3988_vm14, %v1335_v1, %v2326_v46  ;;  %vm3993_vm12 = vmmov %vm3991_vm3 }
 0x2a1   : > { %v1359_v37 = vpack.c.bf16 %v1351_v10, %v1350_v24  ;;  %vm3994_vm14 = vmmov %vm3991_vm3 }
 0x2aa   : > { %2064 = vmatmul.msk.bf16.gmra.mxu2 %vm3989_vm0, %v1359_v37  ;;  %vm3996_vm0 = vmmov %vm3991_vm3 }
 0x2b2   : > { %v1445_v15 = vpop.f32.mrf.mxu2 }
 0x2b3   : > { %v3423_v39 = vadd.f32 %v3420_v48, %v1445_v15 }
 0x2b5   : > { %v1485_v59 = vrot.slane %v3423_v39, 7  ;;  %v1517_v11 = vrot.slane %v3423_v39, 1 }
 0x2ba   : > { %v1447_v28 = vpop.f32.mrf.mxu2 }
 0x2bb   : > { %v1448_v34 = vadd.f32 %v3420_v48, %v1447_v28 }
 0x2bd   : > { %v2327_v50 = vpack.i.bf16 %v1448_v34, %v3423_v39  ;;  %v1486_v29 = vrot.slane %v1448_v34, 7  ;;  %v1518_v2 = vrot.slane %v1448_v34, 1 }
 0x2bf   : > { %2328 = vrot.lane.b32.xlu2 %v2327_v50, %s2475_s14  ;;  %v3435_v44 = vsel %vm3990_vm10, %v1485_v59, %v1486_v29  ;;  %v3447_v20 = vsel %vm3993_vm12, %v1517_v11, %v1518_v2  ;;  %vm3997_vm10 = vmmov %vm3992_vm2 }
 0x2cd   : > { %v1450_v63 = vpop.f32.mrf.mxu2 }
 0x2ce   : > { %v1451_v33 = vadd.f32 %v3420_v48, %v1450_v63 }
 0x2d0   : > { %v1487_v49 = vrot.slane %v1451_v33, 7  ;;  %v1519_v56 = vrot.slane %v1451_v33, 1 }
 0x2d2   : > { %v1546_v13 = vsel %vm3991_vm3, %v1518_v2, %v1519_v56  ;;  %v3441_v5 = vsel %vm3992_vm2, %v1486_v29, %v1487_v49  ;;  %vm3998_vm3 = vmmov %vm3996_vm0 }
 0x2d3   : > { %v1566_v61 = vsel %vm2634_vm4, %v3435_v44, %v1546_v13  ;;  %vm3995_vm4 = vmmov %vm3992_vm2 }
 0x2d4   : > { %v2332_v27 = vpack.i.bf16 %v1566_v61, %v3447_v20  ;;  %vm4001_vm12 = vmmov %vm3995_vm4 }
 0x2d5   : > { %v1452_v23 = vpop.f32.mrf.mxu2 }
 0x2d6   : > { %v1453_v18 = vadd.f32 %v3420_v48, %v1452_v23  ;;  %2333 = vrot.lane.b32.xlu0 %v2332_v27, %s2476_s16 }
 0x2d8   : > { %v1520_v35 = vrot.slane %v1453_v18, 1  ;;  %v2337_v14 = vpack.i.bf16 %v1453_v18, %v1451_v33  ;;  %v1488_v41 = vrot.slane %v1453_v18, 7 }
 0x2da   : > { %2338 = vrot.lane.b32.xlu1 %v2337_v14, %s2475_s14  ;;  %v3458_v4 = vsel %vm3994_vm14, %v1519_v56, %v1520_v35  ;;  %v3467_v52 = vsel %vm3995_vm4, %v1487_v49, %v1488_v41  ;;  %vm4002_vm14 = vmmov %vm3996_vm0 }
 0x2db   : > { %v1551_v40 = vsel %vm2673_vm5, %v3458_v4, %v3441_v5 }
 0x2dd   : > { %v1455_v17 = vpop.f32.mrf.mxu2 }
 0x2de   : > { %v1456_v8 = vadd.f32 %v3420_v48, %v1455_v17 }
 0x2e0   : > { %v1489_v45 = vrot.slane %v1456_v8, 7  ;;  %v1521_v42 = vrot.slane %v1456_v8, 1 }
 0x2e2   : > { %v1544_v7 = vsel %vm3996_vm0, %v1520_v35, %v1521_v42  ;;  %v3473_v46 = vsel %vm3997_vm10, %v1488_v41, %v1489_v45  ;;  %vm4006_vm10 = vnez %v3902_v62 }
 0x2e3   : > { %v1568_v60 = vsel %vm2692_vm6, %v3467_v52, %v1544_v7  ;;  %vm3999_vm6 = vmmov %vm3992_vm2 }
 0x2e4   : > { %v2342_v1 = vpack.i.bf16 %v1568_v60, %v3458_v4  ;;  %vm4000_vm2 = vmmov %vm3996_vm0 }
 0x2e5   : > { %v1457_v26 = vpop.f32.mrf.mxu2 }
 0x2e6   : > { %v1458_v6 = vadd.f32 %v3420_v48, %v1457_v26  ;;  %2343 = vrot.lane.b32.xlu2 %v2342_v1, %s2476_s16 }
 0x2e8   : > { %v1522_v24 = vrot.slane %v1458_v6, 1  ;;  %v2347_v10 = vpack.i.bf16 %v1458_v6, %v1456_v8  ;;  %v1490_v28 = vrot.slane %v1458_v6, 7 }
 0x2ea   : > { %2348 = vrot.lane.b32.xlu0 %v2347_v10, %s2475_s14  ;;  %v3484_v37 = vsel %vm3998_vm3, %v1521_v42, %v1522_v24  ;;  %v3493_v29 = vsel %vm3999_vm6, %v1489_v45, %v1490_v28  ;;  %vm4007_vm3 = vmmov %vm4000_vm2 }
 0x2eb   : > { %v1553_v3 = vsel %vm2719_vm7, %v3484_v37, %v3473_v46 }
 0x2ed   : > { %v1460_v15 = vpop.f32.mrf.mxu2 }
 0x2ee   : > { %v1461_v34 = vadd.f32 %v3420_v48, %v1460_v15 }
 0x2f0   : > { %v1491_v50 = vrot.slane %v1461_v34, 7  ;;  %v1523_v63 = vrot.slane %v1461_v34, 1 }
 0x2f2   : > { %v1542_v33 = vsel %vm4000_vm2, %v1522_v24, %v1523_v63  ;;  %v3499_v2 = vsel %vm4001_vm12, %v1490_v28, %v1491_v50 }
 0x2f3   : > { %v1570_v49 = vsel %vm2738_vm8, %v3493_v29, %v1542_v33  ;;  %vm4003_vm8 = vmmov %vm3995_vm4 }
 0x2f4   : > { %v2352_v56 = vpack.i.bf16 %v1570_v49, %v3484_v37  ;;  %vm4004_vm4 = vmmov %vm3996_vm0 }
 0x2f5   : > { %v1462_v13 = vpop.f32.mrf.mxu2  ;;  %vm4005_vm0 = vmmov %vm3999_vm6 }
 0x2f6   : > { %v1463_v61 = vadd.f32 %v3420_v48, %v1462_v13  ;;  %2353 = vrot.lane.b32.xlu1 %v2352_v56, %s2476_s16  ;;  %vm4008_vm6 = vmmov %vm4005_vm0 }
 0x2f7   : > { %vm4009_vm12 = vmmov %vm4005_vm0 }
 0x2f8   : > { %v1524_v27 = vrot.slane %v1463_v61, 1  ;;  %v2357_v23 = vpack.i.bf16 %v1463_v61, %v1461_v34  ;;  %v1492_v14 = vrot.slane %v1463_v61, 7 }
 0x2fa   : > { %2358 = vrot.lane.b32.xlu2 %v2357_v23, %s2475_s14  ;;  %v3510_v18 = vsel %vm4002_vm14, %v1523_v63, %v1524_v27  ;;  %v3519_v45 = vsel %vm4003_vm8, %v1491_v50, %v1492_v14  ;;  %vm4010_vm14 = vnez %v3908_v36  ;;  %vm4011_vm8 = vmmov %vm4000_vm2 }
 0x2fb   : > { %v1555_v25 = vsel %vm2765_vm9, %v3510_v18, %v3499_v2 }
 0x2fd   : > { %v1465_v35 = vpop.f32.mrf.mxu2 }
 0x2fe   : > { %v1466_v17 = vadd.f32 %v3420_v48, %v1465_v35  ;;  %v2121_v35 = vld [vmem:[%s3856_s7 + $0x28] sm:$0xff] }
 0x2ff   : > { %1827 = vmatpush.bf16.msra.mxu3 %v2121_v35 }
 0x300   : > { %v1493_v41 = vrot.slane %v1466_v17, 7  ;;  %v1525_v8 = vrot.slane %v1466_v17, 1 }
 0x302   : > { %v1540_v42 = vsel %vm4004_vm4, %v1524_v27, %v1525_v8  ;;  %v3525_v7 = vsel %vm4005_vm0, %v1492_v14, %v1493_v41  ;;  %vm4012_vm4 = vmmov %vm4005_vm0 }
 0x303   : > { %v1572_v60 = vsel %vm4006_vm10, %v3519_v45, %v1540_v42  ;;  %vm4013_vm0 = vmmov %vm4000_vm2 }
 0x304   : > { %v2362_v1 = vpack.i.bf16 %v1572_v60, %v3510_v18  ;;  %vm4014_vm10 = vmmov %vm4012_vm4 }
 0x305   : > { %v1467_v26 = vpop.f32.mrf.mxu2 }
 0x306   : > { %v1468_v6 = vadd.f32 %v3420_v48, %v1467_v26  ;;  %2363 = vrot.lane.b32.xlu0 %v2362_v1, %s2476_s16  ;;  %v2119_v1 = vld [vmem:[%s3856_s7 + $0x18] sm:$0xff] }
 0x308   : > { %v1526_v24 = vrot.slane %v1468_v6, 1  ;;  %v2367_v10 = vpack.i.bf16 %v1468_v6, %v1466_v17  ;;  %v1494_v34 = vrot.slane %v1468_v6, 7 }
 0x30a   : > { %2368 = vrot.lane.b32.xlu1 %v2367_v10, %s2475_s14  ;;  %v3536_v15 = vsel %vm4007_vm3, %v1525_v8, %v1526_v24  ;;  %v3545_v49 = vsel %vm4008_vm6, %v1493_v41, %v1494_v34  ;;  %v2120_v8 = vld [vmem:[%s3856_s7 + $0x20] sm:$0xff]  ;;  %vm4015_vm3 = vnez %v3914_v53  ;;  %vm4016_vm6 = vmmov %vm4013_vm0 }
 0x30b   : > { %v1557_v62 = vsel %vm2811_vm11, %v3536_v15, %v3525_v7  ;;  %1828 = vmatpush.bf16.msra.mxu3 %v2120_v8  ;;  %v2116_v53 = vld [vmem:[%s3856_s7] sm:$0xff] }
 0x30d   : > { %v1470_v28 = vpop.f32.mrf.mxu2 }
 0x30e   : > { %v1471_v50 = vadd.f32 %v3420_v48, %v1470_v28  ;;  %v2118_v28 = vld [vmem:[%s3856_s7 + $0x10] sm:$0xff] }
 0x30f   : > { %1829 = vmatpush.bf16.msra.mxu3 %v2119_v1 }
 0x310   : > { %v1495_v63 = vrot.slane %v1471_v50, 7  ;;  %v1527_v33 = vrot.slane %v1471_v50, 1 }
 0x312   : > { %v1538_v56 = vsel %vm4000_vm2, %v1526_v24, %v1527_v33  ;;  %v3551_v13 = vsel %vm4009_vm12, %v1494_v34, %v1495_v63  ;;  %vm4017_vm2 = vmmov %vm4012_vm4 }
 0x313   : > { %v1574_v61 = vsel %vm4010_vm14, %v3545_v49, %v1538_v56  ;;  %1830 = vmatpush.bf16.msra.mxu3 %v2118_v28  ;;  %vm4018_vm12 = vmmov %vm4013_vm0 }
 0x314   : > { %v2372_v27 = vpack.i.bf16 %v1574_v61, %v3536_v15  ;;  %v2117_v61 = vld [vmem:[%s3856_s7 + $0x8] sm:$0xff]  ;;  %vm4019_vm14 = vmmov %vm4017_vm2 }
 0x315   : > { %v1472_v23 = vpop.f32.mrf.mxu2 }
 0x316   : > { %v1473_v14 = vadd.f32 %v3420_v48, %v1472_v23  ;;  %2373 = vrot.lane.b32.xlu2 %v2372_v27, %s2476_s16 }
 0x317   : > { %1831 = vmatpush.bf16.msra.mxu3 %v2117_v61 }
 0x318   : > { %v1528_v17 = vrot.slane %v1473_v14, 1  ;;  %v2377_v41 = vpack.i.bf16 %v1473_v14, %v1471_v50  ;;  %v1496_v26 = vrot.slane %v1473_v14, 7 }
 0x31a   : > { %2378 = vrot.lane.b32.xlu0 %v2377_v41, %s2475_s14  ;;  %v3568_v36 = vsel %vm4011_vm8, %v1527_v33, %v1528_v17  ;;  %v3583_v34 = vsel %vm4012_vm4, %v1495_v63, %v1496_v26  ;;  %vm4020_vm8 = vnez %v3920_v51  ;;  %vm4021_vm4 = vmmov %vm4017_vm2 }
 0x31b   : > { %v1559_v42 = vsel %vm2860_vm13, %v3568_v36, %v3551_v13  ;;  %1832 = vmatpush.bf16.msra.mxu3 %v2116_v53 }
 0x31d   : > { %v1475_v60 = vpop.f32.mrf.mxu2 }
 0x31e   : > { %v1476_v6 = vadd.f32 %v3420_v48, %v1475_v60 }
 0x320   : > { %v1497_v24 = vrot.slane %v1476_v6, 7  ;;  %v1529_v10 = vrot.slane %v1476_v6, 1 }
 0x322   : > { %v1536_v50 = vsel %vm4013_vm0, %v1528_v17, %v1529_v10  ;;  %v3589_v33 = vsel %vm4014_vm10, %v1496_v26, %v1497_v24  ;;  %vm4022_vm10 = vmmov %vm4013_vm0 }
 0x323   : > { %v1576_v56 = vsel %vm4015_vm3, %v3583_v34, %v1536_v50  ;;  %vm4023_vm3 = vnez %v3925_v57 }
 0x324   : > { %v2382_v27 = vpack.i.bf16 %v1576_v56, %v3568_v36 }
 0x325   : > { %v1477_v63 = vpop.f32.mrf.mxu2 }
 0x326   : > { %v1478_v23 = vadd.f32 %v3420_v48, %v1477_v63  ;;  %2383 = vrot.lane.b32.xlu1 %v2382_v27, %s2476_s16 }
 0x328   : > { %v1530_v35 = vrot.slane %v1478_v23, 1  ;;  %v2387_v14 = vpack.i.bf16 %v1478_v23, %v1476_v6  ;;  %v1498_v60 = vrot.slane %v1478_v23, 7 }
 0x32a   : > { %2388 = vrot.lane.b32.xlu2 %v2387_v14, %s2475_s14  ;;  %v3606_v17 = vsel %vm4016_vm6, %v1529_v10, %v1530_v35  ;;  %v3615_v28 = vsel %vm4017_vm2, %v1497_v24, %v1498_v60  ;;  %vm4024_vm6 = vmmov %vm4017_vm2  ;;  %vm4025_vm2 = vnez %v3930_v21 }
 0x32b   : > { %v1561_v41 = vsel %vm2918_vm15, %v3606_v17, %v3589_v33 }
 0x32d   : > { %v1480_v8 = vpop.f32.mrf.mxu2 }
 0x32e   : > { %v1481_v1 = vadd.f32 %v3420_v48, %v1480_v8 }
 0x330   : > { %v1499_v26 = vrot.slane %v1481_v1, 7  ;;  %v1531_v6 = vrot.slane %v1481_v1, 1 }
 0x332   : > { %v1534_v10 = vsel %vm4018_vm12, %v1530_v35, %v1531_v6  ;;  %v3621_v50 = vsel %vm4019_vm14, %v1498_v60, %v1499_v26  ;;  %vm4026_vm12 = vcmask 261120  }
 0x333   : > { %v1578_v56 = vsel %vm4020_vm8, %v3615_v28, %v1534_v10  ;;  %vm4027_vm14 = vmmov %vm4026_vm12  ;;  %vm4028_vm8 = vcmask 523264  }
 0x334   : > { %v2392_v61 = vpack.i.bf16 %v1578_v56, %v3606_v17 }
 0x335   : > { %v1482_v27 = vpop.f32.mrf.mxu2 }
 0x336   : > { %v1483_v63 = vadd.f32 %v3420_v48, %v1482_v27  ;;  %2393 = vrot.lane.b32.xlu0 %v2392_v61, %s2476_s16 }
 0x338   : > { %v1500_v24 = vrot.slane %v1483_v63, 7  ;;  %v1532_v23 = vrot.slane %v1483_v63, 1  ;;  %v2397_v14 = vpack.i.bf16 %v1483_v63, %v1481_v1  ;;  %v2329_v1 = vpop.permute.xlu2 %2328 }
 0x33a   : > { %2398 = vrot.lane.b32.xlu1 %v2397_v14, %s2475_s14  ;;  %v3632_v35 = vsel %vm4021_vm4, %v1499_v26, %v1500_v24  ;;  %v3636_v51 = vsel %vm4013_vm0, %v1531_v6, %v1532_v23  ;;  %v1548_v48 = vsel %vm4022_vm10, %v1532_v23, %v1517_v11  ;;  %v1516_v26 = vsel %vm4024_vm6, %v1500_v24, %v1485_v59  ;;  %vm4029_vm4 = vmmov %vm4028_vm8  ;;  %s326_s14 = sand.u32 1, %s2465_s10  }
 0x33b   : > { %v1580_v53 = vsel %vm4023_vm3, %v3632_v35, %v1548_v48  ;;  %v1563_v8 = vsel %vm2964_vm1, %v3636_v51, %v3621_v50  ;;  %v2331_v11 = vunpack.i.h.bf16 %v2329_v1  ;;  %v1549_v57 = vsel %vm4025_vm2, %v3447_v20, %v1516_v26  ;;  %vm4031_vm10 = vmmov %vm4026_vm12  ;;  %s1989_s21 = sshll.u32 %s326_s14, 7  ;;  %s1907_s13 = scalar_lea.sflag [#allocation3], %s326_s14 }
 0x33c   : > { %v2402_v60 = vpack.i.bf16 %v1580_v53, %v3636_v51  ;;  %v2330_v6 = vunpack.i.l.bf16 %v2329_v1  ;;  %vm4030_vm0 = vcmask 785408   ;;  %vm4032_vm3 = vmmov %vm4031_vm10  ;;  %s3751_s22 = scalar_lea.vmem [#allocation2], %s1989_s21 }
 0x33d   : > { %v1710_v27 = vsel %vm4026_vm12, %v3435_v44, %v2331_v11  ;;  %vm4033_vm6 = vmmov %vm4029_vm4  ;;  %s1920_s27 = sshll.u32 %s3751_s22, 4  ;;  %s1921_s27 = int_to_ptr.vmem [resolvable:$true] %s1920_s27 }
 0x33e   : > { %2403 = vrot.lane.b32.xlu2 %v2402_v60, %s2476_s16  ;;  %v1709_v63 = vsel %vm4027_vm14, %v1549_v57, %v2330_v6  ;;  %vm4034_vm2 = vmmov %vm4029_vm4  ;;  %s2427_s16 = scalar_lea.hbm %s2426_s29, 128 }
 0x33f   : > { %vm4035_vm12 = vmmov %vm4030_vm0  ;;  %p2428_p11 = scmp.ne.s32.totalorder %s2426_s29, %s2427_s16  ;;  %p2433_p1 = scmp.lt.s32.totalorder %s2431_s23, %s2427_s16 }
 0x340   : > { %v2344_v20 = vpop.permute.xlu2 %2343  ;;  %vm4036_vm5 = vmmov %vm4032_vm3 }
 0x341   : > { %v2346_v48 = vunpack.i.h.bf16 %v2344_v20  ;;  %v2345_v53 = vunpack.i.l.bf16 %v2344_v20  ;;  %vm4037_vm14 = vmmov %vm4032_vm3  ;;  %p2429_p12 = pnand %p2428_p11, %p2567_p5  ;;  %p2434_p2 = por %p2433_p1, %p2432_p0 }
 0x342   : > { %vm4041_vm7 = vmmov %vm4032_vm3 }
 0x343   : > { %vm4046_vm9 = vmmov %vm4036_vm5  ;;  %p2430_p13 = pneg %p2429_p12 }
 0x345   : > { %p2435_p3 = pnand %p2434_p2, %p2430_p13 }
 0x348   : > { %v2334_v10 = vpop.permute.xlu0 %2333 }
 0x349   : > { %v2336_v56 = vunpack.i.h.bf16 %v2334_v10  ;;  %v2335_v61 = vunpack.i.l.bf16 %v2334_v10 }
 0x34b   : > { %v1725_v23 = vsel %vm4028_vm8, %v1709_v63, %v2335_v61  ;;  %v1726_v39 = vsel %vm4029_vm4, %v1710_v27, %v2336_v56  ;;  %vm4038_vm8 = vmmov %vm4034_vm2 }
 0x34c   : > { %v1741_v30 = vpack.c.bf16 %v1726_v39, %v1725_v23  ;;  %v2339_v59 = vpop.permute.xlu1 %2338  ;;  %vm4039_vm4 = vmmov %vm4034_vm2 }
 0x34d   : > { %v2341_v24 = vunpack.i.h.bf16 %v2339_v59  ;;  %v2340_v21 = vunpack.i.l.bf16 %v2339_v59 }
 0x34e   : > { %2089 = vmatmul.msk.bf16.vlgmr.msra.gmra.mxu3 %vm4030_vm0, %v1741_v30 }
 0x34f   : > { %v1711_v44 = vsel %vm4031_vm10, %v1551_v40, %v2340_v21  ;;  %v1712_v14 = vsel %vm4032_vm3, %v3467_v52, %v2341_v24  ;;  %vm4040_vm10 = vmmov %vm4032_vm3 }
 0x350   : > { %v1727_v60 = vsel %vm4033_vm6, %v1711_v44, %v2345_v53  ;;  %v1728_v1 = vsel %vm4034_vm2, %v1712_v14, %v2346_v48  ;;  %vm4042_vm3 = vmmov %vm4034_vm2 }
 0x351   : > { %v1742_v26 = vpack.c.bf16 %v1728_v1, %v1727_v60  ;;  %vm4043_vm6 = vmmov %vm4034_vm2 }
 0x352   : > { %vm4044_vm2 = vmmov %vm4030_vm0 }
 0x354   : > { %v2359_v27 = vpop.permute.xlu2 %2358 }
 0x355   : > { %v2361_v63 = vunpack.i.h.bf16 %v2359_v27  ;;  %v2360_v23 = vunpack.i.l.bf16 %v2359_v27 }
 0x357   : > { %v1716_v16 = vsel %vm4040_vm10, %v3519_v45, %v2361_v63  ;;  %v1715_v46 = vsel %vm4041_vm7, %v1555_v25, %v2360_v23 }
 0x35c   : > { %v2349_v11 = vpop.permute.xlu0 %2348 }
 0x35d   : > { %v2351_v57 = vunpack.i.h.bf16 %v2349_v11  ;;  %v2350_v58 = vunpack.i.l.bf16 %v2349_v11 }
 0x35e   : > { %2090 = vmatmul.msk.bf16.gmra.mxu3 %vm4035_vm12, %v1742_v26  ;;  %vm4045_vm12 = vmmov %vm4036_vm5 }
 0x35f   : > { %v1714_v4 = vsel %vm4036_vm5, %v3493_v29, %v2351_v57  ;;  %v1713_v40 = vsel %vm4037_vm14, %v1553_v3, %v2350_v58  ;;  %vm4047_vm5 = vmmov %vm4042_vm3 }
 0x360   : > { %vm4048_vm14 = vmmov %vm4042_vm3 }
 0x368   : > { %v2354_v6 = vpop.permute.xlu1 %2353 }
 0x369   : > { %v2356_v10 = vunpack.i.h.bf16 %v2354_v6  ;;  %v2355_v5 = vunpack.i.l.bf16 %v2354_v6 }
 0x36b   : > { %v1729_v52 = vsel %vm4038_vm8, %v1713_v40, %v2355_v5  ;;  %v1730_v56 = vsel %vm4039_vm4, %v1714_v4, %v2356_v10  ;;  %vm4049_vm8 = vmmov %vm4030_vm0 }
 0x36c   : > { %v1743_v61 = vpack.c.bf16 %v1730_v56, %v1729_v52  ;;  %vm4050_vm4 = vmmov %vm4041_vm7 }
 0x36d   : > { %vm4051_vm11 = vmmov %vm4050_vm4 }
 0x36e   : > { %2091 = vmatmul.msk.bf16.gmra.mxu3 %vm4030_vm0, %v1743_v61  ;;  %vm4052_vm0 = vmmov %vm4042_vm3 }
 0x36f   : > { %vm4053_vm10 = vmmov %vm4052_vm0 }
 0x370   : > { %v2374_v44 = vpop.permute.xlu2 %2373  ;;  %vm4054_vm7 = vmmov %vm4044_vm2 }
 0x371   : > { %v2376_v2 = vunpack.i.h.bf16 %v2374_v44  ;;  %v2375_v18 = vunpack.i.l.bf16 %v2374_v44 }
 0x378   : > { %v2364_v39 = vpop.permute.xlu0 %2363 }
 0x379   : > { %v2366_v30 = vunpack.i.h.bf16 %v2364_v39  ;;  %v2365_v29 = vunpack.i.l.bf16 %v2364_v39 }
 0x37b   : > { %v1731_v37 = vsel %vm4042_vm3, %v1715_v46, %v2365_v29  ;;  %v1732_v3 = vsel %vm4043_vm6, %v1716_v16, %v2366_v30  ;;  %vm4055_vm3 = vmmov %vm4050_vm4 }
 0x37c   : > { %v1744_v59 = vpack.c.bf16 %v1732_v3, %v1731_v37  ;;  %v2369_v24 = vpop.permute.xlu1 %2368  ;;  %vm4056_vm13 = vmmov %vm4055_vm3 }
 0x37d   : > { %v2371_v21 = vunpack.i.h.bf16 %v2369_v24  ;;  %v2370_v20 = vunpack.i.l.bf16 %v2369_v24  ;;  %vm4057_vm6 = vmmov %vm4052_vm0 }
 0x37e   : > { %2092 = vmatmul.msk.bf16.gmra.mxu3 %vm4044_vm2, %v1744_v59  ;;  %vm4058_vm2 = vmmov %vm4052_vm0 }
 0x37f   : > { %v1718_v45 = vsel %vm4045_vm12, %v3545_v49, %v2371_v21  ;;  %v1717_v47 = vsel %vm4046_vm9, %v1557_v62, %v2370_v20  ;;  %vm4059_vm12 = vmmov %vm4054_vm7 }
 0x380   : > { %v1733_v25 = vsel %vm4047_vm5, %v1717_v47, %v2375_v18  ;;  %v1734_v14 = vsel %vm4048_vm14, %v1718_v45, %v2376_v2  ;;  %vm4060_vm9 = vmmov %vm4055_vm3  ;;  %v4072_v2 = vld [vmem:[#allocation5_spill] sm:$0xff] }
 0x381   : > { %v1745_v48 = vpack.c.bf16 %v1734_v14, %v1733_v25  ;;  %vm4061_vm15 = vmmov %vm4055_vm3  ;;  %v4074_v14 = vld [vmem:[#allocation6_spill] sm:$0xff] }
 0x382   : > { %vm4062_vm5 = vmmov %vm4052_vm0 }
 0x383   : > { %vm4063_vm14 = vmmov %vm4052_vm0 }
 0x384   : > { %v2389_v58 = vpop.permute.xlu2 %2388  ;;  %vm4065_vm1 = vmmov %vm4055_vm3 }
 0x385   : > { %v2391_v6 = vunpack.i.h.bf16 %v2389_v58  ;;  %v2390_v10 = vunpack.i.l.bf16 %v2389_v58 }
 0x387   : > { %v1722_v9 = vsel %vm4055_vm3, %v3615_v28, %v2391_v6  ;;  %v1721_v13 = vsel %vm4056_vm13, %v1561_v41, %v2390_v10  ;;  %v4082_v10 = vld [vmem:[#allocation10_spill] sm:$0xff] }
 0x38c   : > { %v2379_v53 = vpop.permute.xlu0 %2378 }
 0x38d   : > { %v2381_v60 = vunpack.i.h.bf16 %v2379_v53  ;;  %v2380_v1 = vunpack.i.l.bf16 %v2379_v53 }
 0x38e   : > { %2093 = vmatmul.msk.bf16.gmra.mxu3 %vm4049_vm8, %v1745_v48  ;;  %vm4064_vm8 = vmmov %vm4054_vm7 }
 0x38f   : > { %v1720_v7 = vsel %vm4050_vm4, %v3583_v34, %v2381_v60  ;;  %v1719_v15 = vsel %vm4051_vm11, %v1559_v42, %v2380_v1  ;;  %vm4066_vm4 = vmmov %vm4065_vm1  ;;  %v4076_v60 = vld [vmem:[#allocation7_spill] sm:$0xff] }
 0x390   : > { %vm4067_vm11 = vmmov %vm4065_vm1 }
 0x398   : > { %v2384_v49 = vpop.permute.xlu1 %2383  ;;  %v2404_v28 = vpop.permute.xlu2 %2403 }
 0x399   : > { %v2386_v26 = vunpack.i.h.bf16 %v2384_v49  ;;  %v2385_v19 = vunpack.i.l.bf16 %v2384_v49  ;;  %v2406_v17 = vunpack.i.h.bf16 %v2404_v28  ;;  %v2405_v41 = vunpack.i.l.bf16 %v2404_v28  ;;  %v4088_v28 = vld [vmem:[#allocation13_spill] sm:$0xff] }
 0x39b   : > { %v1735_v62 = vsel %vm4052_vm0, %v1719_v15, %v2385_v19  ;;  %v1736_v11 = vsel %vm4053_vm10, %v1720_v7, %v2386_v26  ;;  %vm4068_vm0 = vmmov %vm4065_vm1  ;;  %v4078_v19 = vld [vmem:[#allocation8_spill] sm:$0xff] }
 0x39c   : > { %v1746_v57 = vpack.c.bf16 %v1736_v11, %v1735_v62  ;;  %vm4069_vm10 = vmmov %vm4068_vm0  ;;  %v4080_v11 = vld [vmem:[#allocation9_spill] sm:$0xff] }
 0x39d   : > { %vm4071_vm3 = vmmov %vm4068_vm0 }
 0x39e   : > { %2094 = vmatmul.msk.bf16.gmra.mxu3 %vm4054_vm7, %v1746_v57  ;;  %vm4070_vm7 = vmmov %vm4068_vm0 }
 0x39f   : > { %vm4073_vm13 = vmmov %vm4068_vm0 }
 0x3a8   : > { %v2394_v5 = vpop.permute.xlu0 %2393 }
 0x3a9   : > { %v2396_v4 = vunpack.i.h.bf16 %v2394_v5  ;;  %v2395_v34 = vunpack.i.l.bf16 %v2394_v5 }
 0x3ab   : > { %v1737_v36 = vsel %vm4057_vm6, %v1721_v13, %v2395_v34  ;;  %v1738_v42 = vsel %vm4058_vm2, %v1722_v9, %v2396_v4  ;;  %vm4075_vm6 = vmmov %vm4068_vm0  ;;  %v4084_v9 = vld [vmem:[#allocation11_spill] sm:$0xff] }
 0x3ac   : > { %v1747_v40 = vpack.c.bf16 %v1738_v42, %v1737_v36  ;;  %v2399_v52 = vpop.permute.xlu1 %2398  ;;  %vm4077_vm2 = vmmov %vm4068_vm0 }
 0x3ad   : > { %v2401_v56 = vunpack.i.h.bf16 %v2399_v52  ;;  %v2400_v61 = vunpack.i.l.bf16 %v2399_v52 }
 0x3ae   : > { %2095 = vmatmul.msk.bf16.gmra.mxu3 %vm4059_vm12, %v1747_v40  ;;  %vm4079_vm12 = vmmov %vm4068_vm0  ;;  %v4086_v40 = vld [vmem:[#allocation12_spill] sm:$0xff] }
 0x3af   : > { %v1724_v55 = vsel %vm4060_vm9, %v3632_v35, %v2401_v56  ;;  %v1723_v33 = vsel %vm4061_vm15, %v1563_v8, %v2400_v61  ;;  %v3745_v35 = vld [vmem:[%s3857_s8] ss:$0 sm:$0xff]  ;;  %vm4081_vm9 = vmmov %vm4068_vm0 }
 0x3b0   : > { %v1739_v27 = vsel %vm4062_vm5, %v1723_v33, %v2405_v41  ;;  %v1740_v63 = vsel %vm4063_vm14, %v1724_v55, %v2406_v17  ;;  %vm4083_vm15 = vmmov %vm4068_vm0 }
 0x3b1   : > { %v1748_v23 = vpack.c.bf16 %v1740_v63, %v1739_v27  ;;  %vm4085_vm5 = vmmov %vm4068_vm0 }
 0x3b2   : > { %vm4087_vm14 = vmmov %vm4068_vm0 }
 0x3be   : > { %2096 = vmatmul.msk.bf16.gmra.mxu3 %vm4064_vm8, %v1748_v23  ;;  %vm4089_vm8 = vmmov %vm4068_vm0 }
 0x3d1   : > { %v1834_v43 = vpop.f32.mrf.mxu3 }
 0x3d2   : > { %v1835_v50 = vadd.f32 %v3745_v35, %v1834_v43 }
 0x3d4   : > { %v1874_v51 = vadd.f32 %v1835_v50, %v2618_v31 }
 0x3d6   : > { %1890 = vst.msk [vmem:[%s3751_s22] sm:$0xff] %vm4065_vm1, %v1874_v51 }
 0x3d9   : > { %v1836_v8 = vpop.f32.mrf.mxu3 }
 0x3da   : > { %v1837_v39 = vadd.f32 %v3745_v35, %v1836_v8 }
 0x3dc   : > { %v1875_v30 = vadd.f32 %v1837_v39, %v2621_v32 }
 0x3de   : > { %1891 = vst.msk [vmem:[%s3751_s22 + $0x8] sm:$0xff] %vm4066_vm4, %v1875_v30 }
 0x3e1   : > { %v1839_v29 = vpop.f32.mrf.mxu3 }
 0x3e2   : > { %v1840_v31 = vadd.f32 %v3745_v35, %v1839_v29 }
 0x3e4   : > { %v1876_v16 = vadd.f32 %v1840_v31, %v2629_v38 }
 0x3e6   : > { %1892 = vst.msk [vmem:[%s3751_s22 + $0x10] sm:$0xff] %vm4067_vm11, %v1876_v16 }
 0x3e9   : > { %v1841_v46 = vpop.f32.mrf.mxu3 }
 0x3ea   : > { %v1842_v37 = vadd.f32 %v3745_v35, %v1841_v46 }
 0x3ec   : > { %v1877_v3 = vadd.f32 %v1842_v37, %v2666_v54 }
 0x3ee   : > { %1893 = vst.msk [vmem:[%s3751_s22 + $0x18] sm:$0xff] %vm4068_vm0, %v1877_v3 }
 0x3f1   : > { %v1844_v32 = vpop.f32.mrf.mxu3 }
 0x3f2   : > { %v1845_v59 = vadd.f32 %v3745_v35, %v1844_v32 }
 0x3f4   : > { %v1878_v24 = vadd.f32 %v1845_v59, %v2688_v0 }
 0x3f6   : > { %1894 = vst.msk [vmem:[%s3751_s22 + $0x20] sm:$0xff] %vm4069_vm10, %v1878_v24 }
 0x3f9   : > { %v1846_v38 = vpop.f32.mrf.mxu3 }
 0x3fa   : > { %v1847_v21 = vadd.f32 %v3745_v35, %v1846_v38 }
 0x3fc   : > { %v1879_v20 = vadd.f32 %v1847_v21, %v2712_v12 }
 0x3fe   : > { %1895 = vst.msk [vmem:[%s3751_s22 + $0x28] sm:$0xff] %vm4070_vm7, %v1879_v20 }
 0x401   : > { %v1849_v54 = vpop.f32.mrf.mxu3 }
 0x402   : > { %v1850_v44 = vadd.f32 %v3745_v35, %v1849_v54 }
 0x404   : > { %v1880_v45 = vadd.f32 %v1850_v44, %v2734_v22 }
 0x406   : > { %1896 = vst.msk [vmem:[%s3751_s22 + $0x30] sm:$0xff] %vm4071_vm3, %v1880_v45 }
 0x409   : > { %v1851_v0 = vpop.f32.mrf.mxu3 }
 0x40a   : > { %v1852_v47 = vadd.f32 %v3745_v35, %v1851_v0 }
 0x40c   : > { %v1881_v18 = vadd.f32 %v1852_v47, %v4072_v2 }
 0x40e   : > { %1897 = vst.msk [vmem:[%s3751_s22 + $0x38] sm:$0xff] %vm4073_vm13, %v1881_v18 }
 0x411   : > { %v1854_v12 = vpop.f32.mrf.mxu3 }
 0x412   : > { %v1855_v25 = vadd.f32 %v3745_v35, %v1854_v12 }
 0x414   : > { %v1882_v48 = vadd.f32 %v1855_v25, %v4074_v14 }
 0x416   : > { %1898 = vst.msk [vmem:[%s3751_s22 + $0x40] sm:$0xff] %vm4075_vm6, %v1882_v48 }
 0x419   : > { %v1856_v22 = vpop.f32.mrf.mxu3 }
 0x41a   : > { %v1857_v53 = vadd.f32 %v3745_v35, %v1856_v22 }
 0x41c   : > { %v1883_v1 = vadd.f32 %v1857_v53, %v4076_v60 }
 0x41e   : > { %1899 = vst.msk [vmem:[%s3751_s22 + $0x48] sm:$0xff] %vm4077_vm2, %v1883_v1 }
 0x421   : > { %v1859_v49 = vpop.f32.mrf.mxu3 }
 0x422   : > { %v1860_v26 = vadd.f32 %v3745_v35, %v1859_v49 }
 0x424   : > { %v1884_v7 = vadd.f32 %v1860_v26, %v4078_v19 }
 0x426   : > { %1900 = vst.msk [vmem:[%s3751_s22 + $0x50] sm:$0xff] %vm4079_vm12, %v1884_v7 }
 0x429   : > { %v1861_v15 = vpop.f32.mrf.mxu3 }
 0x42a   : > { %v1862_v62 = vadd.f32 %v3745_v35, %v1861_v15 }
 0x42c   : > { %v1885_v57 = vadd.f32 %v1862_v62, %v4080_v11 }
 0x42e   : > { %1901 = vst.msk [vmem:[%s3751_s22 + $0x58] sm:$0xff] %vm4081_vm9, %v1885_v57 }
 0x431   : > { %v1864_v58 = vpop.f32.mrf.mxu3 }
 0x432   : > { %v1865_v6 = vadd.f32 %v3745_v35, %v1864_v58 }
 0x434   : > { %v1886_v5 = vadd.f32 %v1865_v6, %v4082_v10 }
 0x436   : > { %1902 = vst.msk [vmem:[%s3751_s22 + $0x60] sm:$0xff] %vm4083_vm15, %v1886_v5 }
 0x439   : > { %v1866_v4 = vpop.f32.mrf.mxu3 }
 0x43a   : > { %v1867_v34 = vadd.f32 %v3745_v35, %v1866_v4 }
 0x43c   : > { %v1887_v13 = vadd.f32 %v1867_v34, %v4084_v9 }
 0x43e   : > { %1903 = vst.msk [vmem:[%s3751_s22 + $0x68] sm:$0xff] %vm4085_vm5, %v1887_v13 }
 0x441   : > { %v1869_v36 = vpop.f32.mrf.mxu3 }
 0x442   : > { %v1870_v42 = vadd.f32 %v3745_v35, %v1869_v36 }
 0x444   : > { %v1888_v52 = vadd.f32 %v1870_v42, %v4086_v40 }
 0x446   : > { %1904 = vst.msk [vmem:[%s3751_s22 + $0x70] sm:$0xff] %vm4087_vm14, %v1888_v52 }
 0x449   : > { %v1871_v56 = vpop.f32.mrf.mxu3 }
 0x44a   : > { %v1872_v61 = vadd.f32 %v3745_v35, %v1871_v56 }
 0x44c   : > { %v1889_v55 = vadd.f32 %v1872_v61, %v4088_v28 }
 0x44e   : > { %1905 = vst.msk [vmem:[%s3751_s22 + $0x78] sm:$0xff] %vm4089_vm8, %v1889_v55 }
 0x44f   : > { %2438 = shalt.err (!%p2435_p3)
}
 0x450   : > { %s2477_s14 = smov 128   ;;  %s2478_s22 = smov 8  }
 0x451   : > { %2124 = dma.vmem_to_hbm [thread:$0]  (%p2567_p5), %s1921_s27, 2048, %s1923_s28, %s1907_s13, %s2477_s14, %s2477_s14, %s2478_s22  }
 0x452 PF: > { %p2130_p4 = scmp.ge.s32.totalorder %s2473_s12, 2  ;;  %s1937_s26 = sand.u32 1, %s2461_s30  }
 0x453   : > { %s1938_s17 = scalar_lea.sflag [#allocation3], %s1937_s26 }
 0x454   : > { %p2127_p7 = pnand %p2130_p4, %p2571_p6 }
 0x456   : > { %p2128_p8 = pneg %p2127_p7 }
 0x458   : > { %2456 = dma.done.wait (%p2128_p8), %s1938_s17, 2048  }
 0x459   : > { %2458 = vsyncadd (%p2128_p8), %s1938_s17, 4294965248  ;;  %p19_p9 = scmp.ge.s32.totalorder %s2554_s15, 6   ;;  %s4090_s30 = smov %s2465_s10 }
 0x45a   : > { %s4091_s10 = smov %s2469_s11  ;;  %s4092_s11 = smov %s2565_s18 }
 0x45b   : > { %s4093_s12 = smov %s2554_s15  ;;  %21 = sbr.rel (!%p19_p9) target bundleno = 3 (0x3), region = 91 }
 0x460   :  { %1944 = vsyncpa [#allocation3], 1 }
 0x461   :  { %1946 = vsyncpa [#allocation3 + $0x1], 1 }

</bundles_post_ra>
